<compile_context>
chip_gen: v7x
topology: tpu7x:2x2x1
jax: 0.10.0
libtpu: 0.0.40
codegen_flags: <defaults>
</compile_context>

<pallas_src>
import math
import functools

import numpy as np
import jax
import jax.numpy as jnp
from jax.experimental import pallas as pl
from jax.experimental.pallas import tpu as pltpu


def _encoder_block_kernel(
    x_ref,                      # (Bt*S, H) f32, tiled over the batch grid
    qmask_ref,                  # (Bt*S, 1) f32, additive query-row mask (0 / -inf)
    wqkv_ref,                   # (H, 3H) bf16, VMEM-resident (single buffer)
    wo_ref,                     # (H, H)  bf16
    g1_ref, beta1_ref,          # (1, H)  f32
    w1_ref, b1_ref,             # (H, F) bf16, (1, F) f32
    w2_ref, b2_ref,             # (F, H) bf16, (1, H) f32
    g2_ref, beta2_ref,          # (1, H)  f32
    out_ref,                    # (Bt*S, H) f32
    ctx_ref,                    # VMEM scratch (Bt, S, H) bf16
    *, num_heads, block_batch, seq_len, eps):
    bt, S = block_batch, seq_len
    x = x_ref[...]                               # (M, H) f32
    M, H = x.shape
    d = H // num_heads

    # ---- fused QKV projection (bf16 MXU operands, f32 accumulation) --------
    # 1/sqrt(d) is already folded into the Wq columns at weight-prep time.
    xb = x.astype(jnp.bfloat16)
    qkv = jnp.dot(xb, wqkv_ref[...], preferred_element_type=jnp.float32)
    q3 = qkv[:, 0:H].reshape(bt, S, H).astype(jnp.bfloat16)       # (Bt, S, H)
    k3 = qkv[:, H:2 * H].reshape(bt, S, H).astype(jnp.bfloat16)
    v3 = qkv[:, 2 * H:3 * H].reshape(bt, S, H).astype(jnp.bfloat16)

    # ---- additive query-row mask: one broadcast add per head ---------------
    qmask = qmask_ref[...].reshape(bt, S, 1)     # (Bt, S, 1) f32, 0 or -inf

    # ---- multi-head self-attention (batched over the Bt sequences) ---------
    # TODO(synk): when d = H/num_heads < 128, a fully merged (bt*nh, S, d)
    # batched path (pltpu.einshape) would also remove the per-head lane slices.
    for h in range(num_heads):                   # static unrolled head loop
        sl = slice(h * d, (h + 1) * d)
        qh, kh, vh = q3[:, :, sl], k3[:, :, sl], v3[:, :, sl]
        s = jnp.einsum("bqd,bkd->bqk", qh, kh,
                       preferred_element_type=jnp.float32)
        s = s + qmask                            # rows past valid_len -> -inf -> NaN (as torch)
        m = jnp.max(s, axis=-1, keepdims=True)
        e = jnp.exp(s - m)
        l = jnp.sum(e, axis=-1, keepdims=True)
        attn = (e * pl.reciprocal(l, approx=True)).astype(jnp.bfloat16)
        ctx_ref[:, :, sl] = jnp.einsum(
            "bqk,bkd->bqd", attn, vh,
            preferred_element_type=jnp.float32).astype(jnp.bfloat16)

    ctx = ctx_ref[...].reshape(M, H)             # bf16 context slab
    attn_out = jnp.dot(ctx, wo_ref[...], preferred_element_type=jnp.float32)

    # ---- AddNorm 1 (f32) ----------------------------------------------------
    y = x + attn_out
    mu = jnp.mean(y, axis=-1, keepdims=True)
    var = jnp.mean((y - mu) ** 2, axis=-1, keepdims=True)
    y1 = (y - mu) * jax.lax.rsqrt(var + eps) * g1_ref[...] + beta1_ref[...]

    # ---- position-wise FFN (bf16 MXU; hidden kept bf16 after bias+ReLU) -----
    h1 = jnp.dot(y1.astype(jnp.bfloat16), w1_ref[...],
                 preferred_element_type=jnp.float32)
    h1 = jnp.maximum(h1 + b1_ref[...], 0.0).astype(jnp.bfloat16)
    ffn = jnp.dot(h1, w2_ref[...], preferred_element_type=jnp.float32) + b2_ref[...]

    # ---- AddNorm 2 (f32) -----------------------------------------------------
    z = y1 + ffn
    mu2 = jnp.mean(z, axis=-1, keepdims=True)
    var2 = jnp.mean((z - mu2) ** 2, axis=-1, keepdims=True)
    out_ref[...] = (z - mu2) * jax.lax.rsqrt(var2 + eps) * g2_ref[...] + beta2_ref[...]


def prepare_encoder_weights(params, *, num_heads):
    """One-time weight prep (run once, NOT per forward): fold 1/sqrt(d) into Wq,
    fuse Wq/Wk/Wv into a single (H, 3H) matrix, cast matmul weights to bf16."""
    H = params["wq"].shape[0]
    scale = 1.0 / math.sqrt(H / num_heads)       # key_size = H / num_heads
    wqkv = jnp.concatenate(
        [params["wq"] * scale, params["wk"], params["wv"]], axis=1
    ).astype(jnp.bfloat16)
    return dict(
        wqkv=wqkv,
        wo=params["wo"].astype(jnp.bfloat16),
        w1=params["w1"].astype(jnp.bfloat16),
        w2=params["w2"].astype(jnp.bfloat16),
        b1=params["b1"].astype(jnp.float32),
        b2=params["b2"].astype(jnp.float32),
        g1=params["g1"].astype(jnp.float32),
        beta1=params["beta1"].astype(jnp.float32),
        g2=params["g2"].astype(jnp.float32),
        beta2=params["beta2"].astype(jnp.float32),
    )


def _pick_block_batch(B, S, target_rows=512):
    """Largest batch-per-step so the matmul M dim is ~target_rows of rows.
    Prefer >= 2 grid steps once the tile already fills the MXU M dim so the
    'parallel' batch axis can shard across megacore / the 2 TCs on v7x; on a
    1-TC chip (v5e) the extra steps only cost ~0.35us each."""
    divisors = [b for b in range(1, B + 1) if B % b == 0]
    ok = [b for b in divisors if b == B or (b * S) % 8 == 0]   # sublane-aligned rows
    cand = [b for b in ok if b * S <= max(target_rows, S)] or [min(ok)]
    pref = [b for b in cand if (B // b) >= 2 and b * S >= 256]
    return max(pref) if pref else max(cand)


def _vmem_limit_bytes():
    """~75% of this generation's physical VMEM (~96 MiB on v5e/v6e, ~48 MiB on
    v7x) instead of a hard-coded cap."""
    try:
        cap = getattr(pltpu.get_tpu_info(), "vmem_capacity_bytes", None)
        if cap:
            return int(0.75 * cap)
    except Exception:
        pass
    return 64 * 1024 * 1024


def encoder_block(x, valid_lens, prepared, *, num_heads):
    B, S, H = x.shape
    assert H % num_heads == 0

    bt = _pick_block_batch(B, S)
    grid = (B // bt,)

    x2d = x.reshape(B * S, H)
    # Additive query-row mask (0 for valid query rows, -inf past valid_len).
    qmask = jnp.where(
        jnp.arange(S, dtype=jnp.int32)[None, :] < valid_lens[:, None].astype(jnp.int32),
        0.0, -jnp.inf).astype(jnp.float32).reshape(B * S, 1)

    kernel = functools.partial(
        _encoder_block_kernel, num_heads=num_heads, block_batch=bt,
        seq_len=S, eps=1e-5)

    # Weights / LN vectors: whole-array VMEM residents -> copied once before
    # the grid runs, single buffer (no double-buffering of ~constant blocks).
    def resident():
        return pl.BlockSpec(memory_space=pltpu.MemorySpace.VMEM)
    # TODO(synk): on v7x (64 MiB VMEM) with very large F, stream w1/w2 from HBM
    # (memory_space=pl.ANY + make_async_copy) or tile the FFN over F instead of
    # keeping the full-size FFN weights resident.

    grid_spec = pltpu.PrefetchScalarGridSpec(
        num_scalar_prefetch=0,
        grid=grid,
        in_specs=[
            pl.BlockSpec((bt * S, H), lambda g: (g, 0)),   # x       (pipelined)
            pl.BlockSpec((bt * S, 1), lambda g: (g, 0)),   # qmask   (pipelined)
            resident(),                                     # wqkv
            resident(),                                     # wo
            resident(), resident(),                         # g1, beta1
            resident(), resident(),                         # w1, b1
            resident(), resident(),                         # w2, b2
            resident(), resident(),                         # g2, beta2
        ],
        out_specs=pl.BlockSpec((bt * S, H), lambda g: (g, 0)),
        scratch_shapes=[pltpu.VMEM((bt, S, H), jnp.bfloat16)],   # bf16 ctx slab
    )
    out2d = pl.pallas_call(
        kernel,
        grid_spec=grid_spec,
        out_shape=jax.ShapeDtypeStruct((B * S, H), jnp.float32),
        compiler_params=pltpu.CompilerParams(
            dimension_semantics=("parallel",),   # batch axis: megacore / 2-TC shardable
            vmem_limit_bytes=_vmem_limit_bytes()),
    )(x2d, qmask, prepared["wqkv"], prepared["wo"],
      prepared["g1"], prepared["beta1"], prepared["w1"], prepared["b1"],
      prepared["w2"], prepared["b2"], prepared["g2"], prepared["beta2"])
    return out2d.reshape(B, S, H)


# ------------------------- pure-JAX reference (for checking) -------------------
def encoder_block_ref(x, valid_lens, params, *, num_heads):
    B, S, H = x.shape
    d = H // num_heads
    scale = 1.0 / math.sqrt(H / num_heads)
    eps = 1e-5

    def ln(t, g, b):
        mu = jnp.mean(t, axis=-1, keepdims=True)
        var = jnp.mean((t - mu) ** 2, axis=-1, keepdims=True)
        return (t - mu) * jax.lax.rsqrt(var + eps) * g + b

    q = x @ params["wq"]; k = x @ params["wk"]; v = x @ params["wv"]
    split = lambda t: t.reshape(B, S, num_heads, d).transpose(0, 2, 1, 3)
    qh, kh, vh = split(q), split(k), split(v)
    s = jnp.einsum("bhid,bhjd->bhij", qh, kh) * scale
    mask = (jnp.arange(S)[None, :] < valid_lens[:, None])[:, None, :, None]
    s = jnp.where(mask, s, -jnp.inf)
    m = jnp.max(s, axis=-1, keepdims=True)
    e = jnp.exp(s - m)
    attn = e / jnp.sum(e, axis=-1, keepdims=True)
    ctx = jnp.einsum("bhij,bhjd->bhid", attn, vh).transpose(0, 2, 1, 3).reshape(B, S, H)
    y1 = ln(x + ctx @ params["wo"], params["g1"], params["beta1"])
    h1 = jnp.maximum(y1 @ params["w1"] + params["b1"], 0.0)
    return ln(y1 + h1 @ params["w2"] + params["b2"], params["g2"], params["beta2"])


def init_params(key, H, F):
    ks = jax.random.split(key, 8)
    sd = 0.05
    return dict(
        wq=jax.random.normal(ks[0], (H, H), jnp.float32) * sd,
        wk=jax.random.normal(ks[1], (H, H), jnp.float32) * sd,
        wv=jax.random.normal(ks[2], (H, H), jnp.float32) * sd,
        wo=jax.random.normal(ks[3], (H, H), jnp.float32) * sd,
        g1=jnp.ones((1, H), jnp.float32),
        beta1=jnp.zeros((1, H), jnp.float32),
        w1=jax.random.normal(ks[4], (H, F), jnp.float32) * sd,
        b1=jax.random.normal(ks[5], (1, F), jnp.float32) * sd,
        w2=jax.random.normal(ks[6], (F, H), jnp.float32) * sd,
        b2=jax.random.normal(ks[7], (1, H), jnp.float32) * sd,
        g2=jnp.ones((1, H), jnp.float32),
        beta2=jnp.zeros((1, H), jnp.float32),
    )


if __name__ == "__main__":
    B, S, H, NH, F = 2, 8, 32, 4, 64
    key = jax.random.PRNGKey(0)
    kx, kp = jax.random.split(key)
    x = jax.random.normal(kx, (B, S, H), jnp.float32)
    valid_lens = jnp.array([S, 6], dtype=jnp.int32)   # batch 1 has masked query rows (NaN, as in torch)
    params = init_params(kp, H, F)

    prepared = prepare_encoder_weights(params, num_heads=NH)   # one-time weight prep
    out = encoder_block(x, valid_lens, prepared, num_heads=NH)
    out = jax.block_until_ready(out)
    assert out.shape == (B, S, H)

    ref = encoder_block_ref(x, valid_lens, params, num_heads=NH)
    # bf16 matmul operands + approx reciprocal -> slightly relaxed tolerance vs f32 reference
    np.testing.assert_allclose(np.asarray(out), np.asarray(ref),
                               rtol=5e-2, atol=5e-2, equal_nan=True)
    print("KERNEL_OK")
</pallas_src>

<mosaic_0001>
module attributes {stable_mosaic.version = 11 : i64} {
  func.func @_encoder_block_kernel(%arg0: i32, %arg1: memref<16x32xf32, #tpu.memory_space<vmem>>, %arg2: memref<16x1xf32, #tpu.memory_space<vmem>>, %arg3: memref<32x96xbf16, #tpu.memory_space<vmem>>, %arg4: memref<32x32xbf16, #tpu.memory_space<vmem>>, %arg5: memref<1x32xf32, #tpu.memory_space<vmem>>, %arg6: memref<1x32xf32, #tpu.memory_space<vmem>>, %arg7: memref<32x64xbf16, #tpu.memory_space<vmem>>, %arg8: memref<1x64xf32, #tpu.memory_space<vmem>>, %arg9: memref<64x32xbf16, #tpu.memory_space<vmem>>, %arg10: memref<1x32xf32, #tpu.memory_space<vmem>>, %arg11: memref<1x32xf32, #tpu.memory_space<vmem>>, %arg12: memref<1x32xf32, #tpu.memory_space<vmem>>, %arg13: memref<16x32xf32, #tpu.memory_space<vmem>>, %arg14: memref<2x8x32xbf16, #tpu.memory_space<vmem>>) attributes {dimension_semantics = [#tpu.dimension_semantics<parallel>], iteration_bounds = array<i64: 1>, scalar_prefetch = 0 : i64, scratch_operands = 1 : i64, tpu.core_type = #tpu.core_type<tc>, window_params = [{transform_indices = @transform_0, window_bounds = array<i64: 16, 32>}, {transform_indices = @transform_1, window_bounds = array<i64: 16, 1>}, {pipeline_mode = #tpu.pipeline_mode<synchronous>, transform_indices = @transform_2, window_bounds = array<i64: 32, 96>}, {pipeline_mode = #tpu.pipeline_mode<synchronous>, transform_indices = @transform_3, window_bounds = array<i64: 32, 32>}, {pipeline_mode = #tpu.pipeline_mode<synchronous>, transform_indices = @transform_4, window_bounds = array<i64: 1, 32>}, {pipeline_mode = #tpu.pipeline_mode<synchronous>, transform_indices = @transform_5, window_bounds = array<i64: 1, 32>}, {pipeline_mode = #tpu.pipeline_mode<synchronous>, transform_indices = @transform_6, window_bounds = array<i64: 32, 64>}, {pipeline_mode = #tpu.pipeline_mode<synchronous>, transform_indices = @transform_7, window_bounds = array<i64: 1, 64>}, {pipeline_mode = #tpu.pipeline_mode<synchronous>, transform_indices = @transform_8, window_bounds = array<i64: 64, 32>}, {pipeline_mode = #tpu.pipeline_mode<synchronous>, transform_indices = @transform_9, window_bounds = array<i64: 1, 32>}, {pipeline_mode = #tpu.pipeline_mode<synchronous>, transform_indices = @transform_10, window_bounds = array<i64: 1, 32>}, {pipeline_mode = #tpu.pipeline_mode<synchronous>, transform_indices = @transform_11, window_bounds = array<i64: 1, 32>}, {transform_indices = @transform_12, window_bounds = array<i64: 16, 32>}]} {
    %c0 = arith.constant 0 : index
    %c0_0 = arith.constant 0 : index
    %0 = vector.load %arg1[%c0, %c0_0] : memref<16x32xf32, #tpu.memory_space<vmem>>, vector<16x32xf32>
    %1 = arith.truncf %0 : vector<16x32xf32> to vector<16x32xbf16>
    %c0_1 = arith.constant 0 : index
    %c0_2 = arith.constant 0 : index
    %2 = vector.load %arg3[%c0_1, %c0_2] : memref<32x96xbf16, #tpu.memory_space<vmem>>, vector<32x96xbf16>
    %cst = arith.constant dense<0.000000e+00> : vector<16x96xf32>
    %3 = tpu.matmul %1, %2, %cst {dimension_numbers = #tpu.dot_dimension_numbers<[1], [0], [0], [1], [0, 0, 1, 1], [], []>} : vector<16x32xbf16>, vector<32x96xbf16>, vector<16x96xf32> -> vector<16x96xf32>
    %4 = vector.extract_strided_slice %3 {offsets = [0, 0], sizes = [16, 32], strides = [1, 1]} : vector<16x96xf32> to vector<16x32xf32>
    %5 = vector.shape_cast %4 : vector<16x32xf32> to vector<2x8x32xf32>
    %6 = arith.truncf %5 : vector<2x8x32xf32> to vector<2x8x32xbf16>
    %7 = vector.extract_strided_slice %3 {offsets = [0, 32], sizes = [16, 32], strides = [1, 1]} : vector<16x96xf32> to vector<16x32xf32>
    %8 = vector.shape_cast %7 : vector<16x32xf32> to vector<2x8x32xf32>
    %9 = arith.truncf %8 : vector<2x8x32xf32> to vector<2x8x32xbf16>
    %10 = vector.extract_strided_slice %3 {offsets = [0, 64], sizes = [16, 32], strides = [1, 1]} : vector<16x96xf32> to vector<16x32xf32>
    %11 = vector.shape_cast %10 : vector<16x32xf32> to vector<2x8x32xf32>
    %12 = arith.truncf %11 : vector<2x8x32xf32> to vector<2x8x32xbf16>
    %c0_3 = arith.constant 0 : index
    %c0_4 = arith.constant 0 : index
    %13 = vector.load %arg2[%c0_3, %c0_4] : memref<16x1xf32, #tpu.memory_space<vmem>>, vector<16x1xf32>
    %14 = vector.shape_cast %13 : vector<16x1xf32> to vector<2x8x1xf32>
    %15 = vector.extract_strided_slice %6 {offsets = [0, 0, 0], sizes = [2, 8, 8], strides = [1, 1, 1]} : vector<2x8x32xbf16> to vector<2x8x8xbf16>
    %16 = vector.extract_strided_slice %9 {offsets = [0, 0, 0], sizes = [2, 8, 8], strides = [1, 1, 1]} : vector<2x8x32xbf16> to vector<2x8x8xbf16>
    %17 = vector.extract_strided_slice %12 {offsets = [0, 0, 0], sizes = [2, 8, 8], strides = [1, 1, 1]} : vector<2x8x32xbf16> to vector<2x8x8xbf16>
    "tpu.trace_start"() <{level = 10 : i32, message = "bqd,bkd->bqk"}> : () -> ()
    %cst_5 = arith.constant dense<0.000000e+00> : vector<2x8x8xf32>
    %18 = tpu.matmul %15, %16, %cst_5 {dimension_numbers = #tpu.dot_dimension_numbers<[2], [2], [1], [1], [0, 0, 0, 1, 1, 1], [0], [0]>} : vector<2x8x8xbf16>, vector<2x8x8xbf16>, vector<2x8x8xf32> -> vector<2x8x8xf32>
    "tpu.trace_stop"() : () -> ()
    %19 = vector.broadcast %14 : vector<2x8x1xf32> to vector<2x8x8xf32>
    %20 = arith.addf %18, %19 : vector<2x8x8xf32>
    %cst_6 = arith.constant dense<0xFF800000> : vector<2x8xf32>
    %21 = vector.multi_reduction <maximumf>, %20, %cst_6 [2] : vector<2x8x8xf32> to vector<2x8xf32>
    %22 = vector.shape_cast %21 : vector<2x8xf32> to vector<2x8x1xf32>
    %23 = vector.broadcast %22 : vector<2x8x1xf32> to vector<2x8x8xf32>
    %24 = arith.subf %20, %23 : vector<2x8x8xf32>
    %25 = math.exp %24 : vector<2x8x8xf32>
    %cst_7 = arith.constant dense<0.000000e+00> : vector<2x8xf32>
    %26 = vector.multi_reduction <add>, %25, %cst_7 [2] : vector<2x8x8xf32> to vector<2x8xf32>
    %27 = vector.shape_cast %26 : vector<2x8xf32> to vector<2x8x1xf32>
    %28 = tpu.reciprocal %27 {approx = true} : vector<2x8x1xf32> -> vector<2x8x1xf32>
    %29 = vector.broadcast %28 : vector<2x8x1xf32> to vector<2x8x8xf32>
    %30 = arith.mulf %25, %29 : vector<2x8x8xf32>
    %31 = arith.truncf %30 : vector<2x8x8xf32> to vector<2x8x8xbf16>
    "tpu.trace_start"() <{level = 10 : i32, message = "bqk,bkd->bqd"}> : () -> ()
    %cst_8 = arith.constant dense<0.000000e+00> : vector<2x8x8xf32>
    %32 = tpu.matmul %31, %17, %cst_8 {dimension_numbers = #tpu.dot_dimension_numbers<[2], [1], [1], [2], [0, 0, 0, 1, 1, 2], [0], [0]>} : vector<2x8x8xbf16>, vector<2x8x8xbf16>, vector<2x8x8xf32> -> vector<2x8x8xf32>
    "tpu.trace_stop"() : () -> ()
    %33 = arith.truncf %32 : vector<2x8x8xf32> to vector<2x8x8xbf16>
    %c0_9 = arith.constant 0 : index
    %c0_10 = arith.constant 0 : index
    %c0_11 = arith.constant 0 : index
    %34 = vector.load %arg14[%c0_9, %c0_10, %c0_11] : memref<2x8x32xbf16, #tpu.memory_space<vmem>>, vector<2x8x8xbf16>
    tpu.vector_store %arg14[%c0_9, %c0_10, %c0_11], %33 {strides = array<i32>} : memref<2x8x32xbf16, #tpu.memory_space<vmem>>, vector<2x8x8xbf16>,
    %35 = vector.extract_strided_slice %6 {offsets = [0, 0, 8], sizes = [2, 8, 8], strides = [1, 1, 1]} : vector<2x8x32xbf16> to vector<2x8x8xbf16>
    %36 = vector.extract_strided_slice %9 {offsets = [0, 0, 8], sizes = [2, 8, 8], strides = [1, 1, 1]} : vector<2x8x32xbf16> to vector<2x8x8xbf16>
    %37 = vector.extract_strided_slice %12 {offsets = [0, 0, 8], sizes = [2, 8, 8], strides = [1, 1, 1]} : vector<2x8x32xbf16> to vector<2x8x8xbf16>
    "tpu.trace_start"() <{level = 10 : i32, message = "bqd,bkd->bqk"}> : () -> ()
    %cst_12 = arith.constant dense<0.000000e+00> : vector<2x8x8xf32>
    %38 = tpu.matmul %35, %36, %cst_12 {dimension_numbers = #tpu.dot_dimension_numbers<[2], [2], [1], [1], [0, 0, 0, 1, 1, 1], [0], [0]>} : vector<2x8x8xbf16>, vector<2x8x8xbf16>, vector<2x8x8xf32> -> vector<2x8x8xf32>
    "tpu.trace_stop"() : () -> ()
    %39 = vector.broadcast %14 : vector<2x8x1xf32> to vector<2x8x8xf32>
    %40 = arith.addf %38, %39 : vector<2x8x8xf32>
    %cst_13 = arith.constant dense<0xFF800000> : vector<2x8xf32>
    %41 = vector.multi_reduction <maximumf>, %40, %cst_13 [2] : vector<2x8x8xf32> to vector<2x8xf32>
    %42 = vector.shape_cast %41 : vector<2x8xf32> to vector<2x8x1xf32>
    %43 = vector.broadcast %42 : vector<2x8x1xf32> to vector<2x8x8xf32>
    %44 = arith.subf %40, %43 : vector<2x8x8xf32>
    %45 = math.exp %44 : vector<2x8x8xf32>
    %cst_14 = arith.constant dense<0.000000e+00> : vector<2x8xf32>
    %46 = vector.multi_reduction <add>, %45, %cst_14 [2] : vector<2x8x8xf32> to vector<2x8xf32>
    %47 = vector.shape_cast %46 : vector<2x8xf32> to vector<2x8x1xf32>
    %48 = tpu.reciprocal %47 {approx = true} : vector<2x8x1xf32> -> vector<2x8x1xf32>
    %49 = vector.broadcast %48 : vector<2x8x1xf32> to vector<2x8x8xf32>
    %50 = arith.mulf %45, %49 : vector<2x8x8xf32>
    %51 = arith.truncf %50 : vector<2x8x8xf32> to vector<2x8x8xbf16>
    "tpu.trace_start"() <{level = 10 : i32, message = "bqk,bkd->bqd"}> : () -> ()
    %cst_15 = arith.constant dense<0.000000e+00> : vector<2x8x8xf32>
    %52 = tpu.matmul %51, %37, %cst_15 {dimension_numbers = #tpu.dot_dimension_numbers<[2], [1], [1], [2], [0, 0, 0, 1, 1, 2], [0], [0]>} : vector<2x8x8xbf16>, vector<2x8x8xbf16>, vector<2x8x8xf32> -> vector<2x8x8xf32>
    "tpu.trace_stop"() : () -> ()
    %53 = arith.truncf %52 : vector<2x8x8xf32> to vector<2x8x8xbf16>
    %c0_16 = arith.constant 0 : index
    %c0_17 = arith.constant 0 : index
    %c8 = arith.constant 8 : index
    %54 = vector.load %arg14[%c0_16, %c0_17, %c8] : memref<2x8x32xbf16, #tpu.memory_space<vmem>>, vector<2x8x8xbf16>
    tpu.vector_store %arg14[%c0_16, %c0_17, %c8], %53 {strides = array<i32>} : memref<2x8x32xbf16, #tpu.memory_space<vmem>>, vector<2x8x8xbf16>,
    %55 = vector.extract_strided_slice %6 {offsets = [0, 0, 16], sizes = [2, 8, 8], strides = [1, 1, 1]} : vector<2x8x32xbf16> to vector<2x8x8xbf16>
    %56 = vector.extract_strided_slice %9 {offsets = [0, 0, 16], sizes = [2, 8, 8], strides = [1, 1, 1]} : vector<2x8x32xbf16> to vector<2x8x8xbf16>
    %57 = vector.extract_strided_slice %12 {offsets = [0, 0, 16], sizes = [2, 8, 8], strides = [1, 1, 1]} : vector<2x8x32xbf16> to vector<2x8x8xbf16>
    "tpu.trace_start"() <{level = 10 : i32, message = "bqd,bkd->bqk"}> : () -> ()
    %cst_18 = arith.constant dense<0.000000e+00> : vector<2x8x8xf32>
    %58 = tpu.matmul %55, %56, %cst_18 {dimension_numbers = #tpu.dot_dimension_numbers<[2], [2], [1], [1], [0, 0, 0, 1, 1, 1], [0], [0]>} : vector<2x8x8xbf16>, vector<2x8x8xbf16>, vector<2x8x8xf32> -> vector<2x8x8xf32>
    "tpu.trace_stop"() : () -> ()
    %59 = vector.broadcast %14 : vector<2x8x1xf32> to vector<2x8x8xf32>
    %60 = arith.addf %58, %59 : vector<2x8x8xf32>
    %cst_19 = arith.constant dense<0xFF800000> : vector<2x8xf32>
    %61 = vector.multi_reduction <maximumf>, %60, %cst_19 [2] : vector<2x8x8xf32> to vector<2x8xf32>
    %62 = vector.shape_cast %61 : vector<2x8xf32> to vector<2x8x1xf32>
    %63 = vector.broadcast %62 : vector<2x8x1xf32> to vector<2x8x8xf32>
    %64 = arith.subf %60, %63 : vector<2x8x8xf32>
    %65 = math.exp %64 : vector<2x8x8xf32>
    %cst_20 = arith.constant dense<0.000000e+00> : vector<2x8xf32>
    %66 = vector.multi_reduction <add>, %65, %cst_20 [2] : vector<2x8x8xf32> to vector<2x8xf32>
    %67 = vector.shape_cast %66 : vector<2x8xf32> to vector<2x8x1xf32>
    %68 = tpu.reciprocal %67 {approx = true} : vector<2x8x1xf32> -> vector<2x8x1xf32>
    %69 = vector.broadcast %68 : vector<2x8x1xf32> to vector<2x8x8xf32>
    %70 = arith.mulf %65, %69 : vector<2x8x8xf32>
    %71 = arith.truncf %70 : vector<2x8x8xf32> to vector<2x8x8xbf16>
    "tpu.trace_start"() <{level = 10 : i32, message = "bqk,bkd->bqd"}> : () -> ()
    %cst_21 = arith.constant dense<0.000000e+00> : vector<2x8x8xf32>
    %72 = tpu.matmul %71, %57, %cst_21 {dimension_numbers = #tpu.dot_dimension_numbers<[2], [1], [1], [2], [0, 0, 0, 1, 1, 2], [0], [0]>} : vector<2x8x8xbf16>, vector<2x8x8xbf16>, vector<2x8x8xf32> -> vector<2x8x8xf32>
    "tpu.trace_stop"() : () -> ()
    %73 = arith.truncf %72 : vector<2x8x8xf32> to vector<2x8x8xbf16>
    %c0_22 = arith.constant 0 : index
    %c0_23 = arith.constant 0 : index
    %c16 = arith.constant 16 : index
    %74 = vector.load %arg14[%c0_22, %c0_23, %c16] : memref<2x8x32xbf16, #tpu.memory_space<vmem>>, vector<2x8x8xbf16>
    tpu.vector_store %arg14[%c0_22, %c0_23, %c16], %73 {strides = array<i32>} : memref<2x8x32xbf16, #tpu.memory_space<vmem>>, vector<2x8x8xbf16>,
    %75 = vector.extract_strided_slice %6 {offsets = [0, 0, 24], sizes = [2, 8, 8], strides = [1, 1, 1]} : vector<2x8x32xbf16> to vector<2x8x8xbf16>
    %76 = vector.extract_strided_slice %9 {offsets = [0, 0, 24], sizes = [2, 8, 8], strides = [1, 1, 1]} : vector<2x8x32xbf16> to vector<2x8x8xbf16>
    %77 = vector.extract_strided_slice %12 {offsets = [0, 0, 24], sizes = [2, 8, 8], strides = [1, 1, 1]} : vector<2x8x32xbf16> to vector<2x8x8xbf16>
    "tpu.trace_start"() <{level = 10 : i32, message = "bqd,bkd->bqk"}> : () -> ()
    %cst_24 = arith.constant dense<0.000000e+00> : vector<2x8x8xf32>
    %78 = tpu.matmul %75, %76, %cst_24 {dimension_numbers = #tpu.dot_dimension_numbers<[2], [2], [1], [1], [0, 0, 0, 1, 1, 1], [0], [0]>} : vector<2x8x8xbf16>, vector<2x8x8xbf16>, vector<2x8x8xf32> -> vector<2x8x8xf32>
    "tpu.trace_stop"() : () -> ()
    %79 = vector.broadcast %14 : vector<2x8x1xf32> to vector<2x8x8xf32>
    %80 = arith.addf %78, %79 : vector<2x8x8xf32>
    %cst_25 = arith.constant dense<0xFF800000> : vector<2x8xf32>
    %81 = vector.multi_reduction <maximumf>, %80, %cst_25 [2] : vector<2x8x8xf32> to vector<2x8xf32>
    %82 = vector.shape_cast %81 : vector<2x8xf32> to vector<2x8x1xf32>
    %83 = vector.broadcast %82 : vector<2x8x1xf32> to vector<2x8x8xf32>
    %84 = arith.subf %80, %83 : vector<2x8x8xf32>
    %85 = math.exp %84 : vector<2x8x8xf32>
    %cst_26 = arith.constant dense<0.000000e+00> : vector<2x8xf32>
    %86 = vector.multi_reduction <add>, %85, %cst_26 [2] : vector<2x8x8xf32> to vector<2x8xf32>
    %87 = vector.shape_cast %86 : vector<2x8xf32> to vector<2x8x1xf32>
    %88 = tpu.reciprocal %87 {approx = true} : vector<2x8x1xf32> -> vector<2x8x1xf32>
    %89 = vector.broadcast %88 : vector<2x8x1xf32> to vector<2x8x8xf32>
    %90 = arith.mulf %85, %89 : vector<2x8x8xf32>
    %91 = arith.truncf %90 : vector<2x8x8xf32> to vector<2x8x8xbf16>
    "tpu.trace_start"() <{level = 10 : i32, message = "bqk,bkd->bqd"}> : () -> ()
    %cst_27 = arith.constant dense<0.000000e+00> : vector<2x8x8xf32>
    %92 = tpu.matmul %91, %77, %cst_27 {dimension_numbers = #tpu.dot_dimension_numbers<[2], [1], [1], [2], [0, 0, 0, 1, 1, 2], [0], [0]>} : vector<2x8x8xbf16>, vector<2x8x8xbf16>, vector<2x8x8xf32> -> vector<2x8x8xf32>
    "tpu.trace_stop"() : () -> ()
    %93 = arith.truncf %92 : vector<2x8x8xf32> to vector<2x8x8xbf16>
    %c0_28 = arith.constant 0 : index
    %c0_29 = arith.constant 0 : index
    %c24 = arith.constant 24 : index
    %94 = vector.load %arg14[%c0_28, %c0_29, %c24] : memref<2x8x32xbf16, #tpu.memory_space<vmem>>, vector<2x8x8xbf16>
    tpu.vector_store %arg14[%c0_28, %c0_29, %c24], %93 {strides = array<i32>} : memref<2x8x32xbf16, #tpu.memory_space<vmem>>, vector<2x8x8xbf16>,
    %c0_30 = arith.constant 0 : index
    %c0_31 = arith.constant 0 : index
    %c0_32 = arith.constant 0 : index
    %95 = vector.load %arg14[%c0_30, %c0_31, %c0_32] : memref<2x8x32xbf16, #tpu.memory_space<vmem>>, vector<2x8x32xbf16>
    %96 = vector.shape_cast %95 : vector<2x8x32xbf16> to vector<16x32xbf16>
    %c0_33 = arith.constant 0 : index
    %c0_34 = arith.constant 0 : index
    %97 = vector.load %arg4[%c0_33, %c0_34] : memref<32x32xbf16, #tpu.memory_space<vmem>>, vector<32x32xbf16>
    %cst_35 = arith.constant dense<0.000000e+00> : vector<16x32xf32>
    %98 = tpu.matmul %96, %97, %cst_35 {dimension_numbers = #tpu.dot_dimension_numbers<[1], [0], [0], [1], [0, 0, 1, 1], [], []>} : vector<16x32xbf16>, vector<32x32xbf16>, vector<16x32xf32> -> vector<16x32xf32>
    %99 = arith.addf %0, %98 : vector<16x32xf32>
    %cst_36 = arith.constant dense<0.000000e+00> : vector<16xf32>
    %100 = vector.multi_reduction <add>, %99, %cst_36 [1] : vector<16x32xf32> to vector<16xf32>
    %101 = vector.shape_cast %100 : vector<16xf32> to vector<16x1xf32>
    %cst_37 = arith.constant 3.200000e+01 : f32
    %102 = vector.broadcast %cst_37 : f32 to vector<16x1xf32>
    %103 = arith.divf %101, %102 : vector<16x1xf32>
    %104 = vector.broadcast %103 : vector<16x1xf32> to vector<16x32xf32>
    %105 = arith.subf %99, %104 : vector<16x32xf32>
    %106 = arith.mulf %105, %105 : vector<16x32xf32>
    %cst_38 = arith.constant dense<0.000000e+00> : vector<16xf32>
    %107 = vector.multi_reduction <add>, %106, %cst_38 [1] : vector<16x32xf32> to vector<16xf32>
    %108 = vector.shape_cast %107 : vector<16xf32> to vector<16x1xf32>
    %cst_39 = arith.constant 3.200000e+01 : f32
    %109 = vector.broadcast %cst_39 : f32 to vector<16x1xf32>
    %110 = arith.divf %108, %109 : vector<16x1xf32>
    %111 = vector.broadcast %103 : vector<16x1xf32> to vector<16x32xf32>
    %112 = arith.subf %99, %111 : vector<16x32xf32>
    %cst_40 = arith.constant 9.99999974E-6 : f32
    %113 = vector.broadcast %cst_40 : f32 to vector<16x1xf32>
    %114 = arith.addf %110, %113 : vector<16x1xf32>
    %115 = math.rsqrt %114 : vector<16x1xf32>
    %116 = vector.broadcast %115 : vector<16x1xf32> to vector<16x32xf32>
    %117 = arith.mulf %112, %116 : vector<16x32xf32>
    %c0_41 = arith.constant 0 : index
    %c0_42 = arith.constant 0 : index
    %118 = vector.load %arg5[%c0_41, %c0_42] : memref<1x32xf32, #tpu.memory_space<vmem>>, vector<1x32xf32>
    %119 = vector.broadcast %118 : vector<1x32xf32> to vector<16x32xf32>
    %120 = arith.mulf %117, %119 : vector<16x32xf32>
    %c0_43 = arith.constant 0 : index
    %c0_44 = arith.constant 0 : index
    %121 = vector.load %arg6[%c0_43, %c0_44] : memref<1x32xf32, #tpu.memory_space<vmem>>, vector<1x32xf32>
    %122 = vector.broadcast %121 : vector<1x32xf32> to vector<16x32xf32>
    %123 = arith.addf %120, %122 : vector<16x32xf32>
    %124 = arith.truncf %123 : vector<16x32xf32> to vector<16x32xbf16>
    %c0_45 = arith.constant 0 : index
    %c0_46 = arith.constant 0 : index
    %125 = vector.load %arg7[%c0_45, %c0_46] : memref<32x64xbf16, #tpu.memory_space<vmem>>, vector<32x64xbf16>
    %cst_47 = arith.constant dense<0.000000e+00> : vector<16x64xf32>
    %126 = tpu.matmul %124, %125, %cst_47 {dimension_numbers = #tpu.dot_dimension_numbers<[1], [0], [0], [1], [0, 0, 1, 1], [], []>} : vector<16x32xbf16>, vector<32x64xbf16>, vector<16x64xf32> -> vector<16x64xf32>
    %c0_48 = arith.constant 0 : index
    %c0_49 = arith.constant 0 : index
    %127 = vector.load %arg8[%c0_48, %c0_49] : memref<1x64xf32, #tpu.memory_space<vmem>>, vector<1x64xf32>
    %128 = vector.broadcast %127 : vector<1x64xf32> to vector<16x64xf32>
    %129 = arith.addf %126, %128 : vector<16x64xf32>
    %cst_50 = arith.constant 0.000000e+00 : f32
    %130 = vector.broadcast %cst_50 : f32 to vector<16x64xf32>
    %131 = arith.maximumf %129, %130 : vector<16x64xf32>
    %132 = arith.truncf %131 : vector<16x64xf32> to vector<16x64xbf16>
    %c0_51 = arith.constant 0 : index
    %c0_52 = arith.constant 0 : index
    %133 = vector.load %arg9[%c0_51, %c0_52] : memref<64x32xbf16, #tpu.memory_space<vmem>>, vector<64x32xbf16>
    %cst_53 = arith.constant dense<0.000000e+00> : vector<16x32xf32>
    %134 = tpu.matmul %132, %133, %cst_53 {dimension_numbers = #tpu.dot_dimension_numbers<[1], [0], [0], [1], [0, 0, 1, 1], [], []>} : vector<16x64xbf16>, vector<64x32xbf16>, vector<16x32xf32> -> vector<16x32xf32>
    %c0_54 = arith.constant 0 : index
    %c0_55 = arith.constant 0 : index
    %135 = vector.load %arg10[%c0_54, %c0_55] : memref<1x32xf32, #tpu.memory_space<vmem>>, vector<1x32xf32>
    %136 = vector.broadcast %135 : vector<1x32xf32> to vector<16x32xf32>
    %137 = arith.addf %134, %136 : vector<16x32xf32>
    %138 = arith.addf %123, %137 : vector<16x32xf32>
    %cst_56 = arith.constant dense<0.000000e+00> : vector<16xf32>
    %139 = vector.multi_reduction <add>, %138, %cst_56 [1] : vector<16x32xf32> to vector<16xf32>
    %140 = vector.shape_cast %139 : vector<16xf32> to vector<16x1xf32>
    %cst_57 = arith.constant 3.200000e+01 : f32
    %141 = vector.broadcast %cst_57 : f32 to vector<16x1xf32>
    %142 = arith.divf %140, %141 : vector<16x1xf32>
    %143 = vector.broadcast %142 : vector<16x1xf32> to vector<16x32xf32>
    %144 = arith.subf %138, %143 : vector<16x32xf32>
    %145 = arith.mulf %144, %144 : vector<16x32xf32>
    %cst_58 = arith.constant dense<0.000000e+00> : vector<16xf32>
    %146 = vector.multi_reduction <add>, %145, %cst_58 [1] : vector<16x32xf32> to vector<16xf32>
    %147 = vector.shape_cast %146 : vector<16xf32> to vector<16x1xf32>
    %cst_59 = arith.constant 3.200000e+01 : f32
    %148 = vector.broadcast %cst_59 : f32 to vector<16x1xf32>
    %149 = arith.divf %147, %148 : vector<16x1xf32>
    %150 = vector.broadcast %142 : vector<16x1xf32> to vector<16x32xf32>
    %151 = arith.subf %138, %150 : vector<16x32xf32>
    %cst_60 = arith.constant 9.99999974E-6 : f32
    %152 = vector.broadcast %cst_60 : f32 to vector<16x1xf32>
    %153 = arith.addf %149, %152 : vector<16x1xf32>
    %154 = math.rsqrt %153 : vector<16x1xf32>
    %155 = vector.broadcast %154 : vector<16x1xf32> to vector<16x32xf32>
    %156 = arith.mulf %151, %155 : vector<16x32xf32>
    %c0_61 = arith.constant 0 : index
    %c0_62 = arith.constant 0 : index
    %157 = vector.load %arg11[%c0_61, %c0_62] : memref<1x32xf32, #tpu.memory_space<vmem>>, vector<1x32xf32>
    %158 = vector.broadcast %157 : vector<1x32xf32> to vector<16x32xf32>
    %159 = arith.mulf %156, %158 : vector<16x32xf32>
    %c0_63 = arith.constant 0 : index
    %c0_64 = arith.constant 0 : index
    %160 = vector.load %arg12[%c0_63, %c0_64] : memref<1x32xf32, #tpu.memory_space<vmem>>, vector<1x32xf32>
    %161 = vector.broadcast %160 : vector<1x32xf32> to vector<16x32xf32>
    %162 = arith.addf %159, %161 : vector<16x32xf32>
    %c0_65 = arith.constant 0 : index
    %c0_66 = arith.constant 0 : index
    %163 = vector.load %arg13[%c0_65, %c0_66] : memref<16x32xf32, #tpu.memory_space<vmem>>, vector<16x32xf32>
    tpu.vector_store %arg13[%c0_65, %c0_66], %162 {strides = array<i32>} : memref<16x32xf32, #tpu.memory_space<vmem>>, vector<16x32xf32>,
    return
  }
  func.func @transform_0(%arg0: i32) -> (i32, i32) {
    %c0_i32 = arith.constant 0 : i32
    %c0_i32_0 = arith.constant 0 : i32
    return %arg0, %c0_i32 : i32, i32
  }
  func.func @transform_1(%arg0: i32) -> (i32, i32) {
    %c0_i32 = arith.constant 0 : i32
    %c0_i32_0 = arith.constant 0 : i32
    return %arg0, %c0_i32 : i32, i32
  }
  func.func @transform_2(%arg0: i32) -> (i32, i32) {
    %c0_i32 = arith.constant 0 : i32
    %c0_i32_0 = arith.constant 0 : i32
    %c0_i32_1 = arith.constant 0 : i32
    return %c0_i32, %c0_i32_0 : i32, i32
  }
  func.func @transform_3(%arg0: i32) -> (i32, i32) {
    %c0_i32 = arith.constant 0 : i32
    %c0_i32_0 = arith.constant 0 : i32
    %c0_i32_1 = arith.constant 0 : i32
    return %c0_i32, %c0_i32_0 : i32, i32
  }
  func.func @transform_4(%arg0: i32) -> (i32, i32) {
    %c0_i32 = arith.constant 0 : i32
    %c0_i32_0 = arith.constant 0 : i32
    %c0_i32_1 = arith.constant 0 : i32
    return %c0_i32, %c0_i32_0 : i32, i32
  }
  func.func @transform_5(%arg0: i32) -> (i32, i32) {
    %c0_i32 = arith.constant 0 : i32
    %c0_i32_0 = arith.constant 0 : i32
    %c0_i32_1 = arith.constant 0 : i32
    return %c0_i32, %c0_i32_0 : i32, i32
  }
  func.func @transform_6(%arg0: i32) -> (i32, i32) {
    %c0_i32 = arith.constant 0 : i32
    %c0_i32_0 = arith.constant 0 : i32
    %c0_i32_1 = arith.constant 0 : i32
    return %c0_i32, %c0_i32_0 : i32, i32
  }
  func.func @transform_7(%arg0: i32) -> (i32, i32) {
    %c0_i32 = arith.constant 0 : i32
    %c0_i32_0 = arith.constant 0 : i32
    %c0_i32_1 = arith.constant 0 : i32
    return %c0_i32, %c0_i32_0 : i32, i32
  }
  func.func @transform_8(%arg0: i32) -> (i32, i32) {
    %c0_i32 = arith.constant 0 : i32
    %c0_i32_0 = arith.constant 0 : i32
    %c0_i32_1 = arith.constant 0 : i32
    return %c0_i32, %c0_i32_0 : i32, i32
  }
  func.func @transform_9(%arg0: i32) -> (i32, i32) {
    %c0_i32 = arith.constant 0 : i32
    %c0_i32_0 = arith.constant 0 : i32
    %c0_i32_1 = arith.constant 0 : i32
    return %c0_i32, %c0_i32_0 : i32, i32
  }
  func.func @transform_10(%arg0: i32) -> (i32, i32) {
    %c0_i32 = arith.constant 0 : i32
    %c0_i32_0 = arith.constant 0 : i32
    %c0_i32_1 = arith.constant 0 : i32
    return %c0_i32, %c0_i32_0 : i32, i32
  }
  func.func @transform_11(%arg0: i32) -> (i32, i32) {
    %c0_i32 = arith.constant 0 : i32
    %c0_i32_0 = arith.constant 0 : i32
    %c0_i32_1 = arith.constant 0 : i32
    return %c0_i32, %c0_i32_0 : i32, i32
  }
  func.func @transform_12(%arg0: i32) -> (i32, i32) {
    %c0_i32 = arith.constant 0 : i32
    %c0_i32_0 = arith.constant 0 : i32
    return %arg0, %c0_i32 : i32, i32
  }
}

</mosaic_0001>

<bundles_post_ra>
// kernel: tpu_custom_call.1
= control target key start
LH: loop header
LB: loop body
LE: loop exit
PB: predicated region body
PF: predicated region fallthrough
CT: control target
= control target key end

     0   :  { %17 = vsyncpa [#allocation4], 0  ;;  %s2627_s0 = inlined_call_operand.hbm [shape: f32[16,32], index: 0, kind: input, shape index: {}]   ;;  %s2628_s1 = inlined_call_operand.hbm [shape: f32[16,1], index: 1, kind: input, shape index: {}]   ;;  %s2629_s2 = inlined_call_operand.hbm [shape: bf16[32,96], index: 2, kind: input, shape index: {}]   ;;  %s2630_s3 = inlined_call_operand.hbm [shape: bf16[32,32], index: 3, kind: input, shape index: {}]   ;;  %s2631_s4 = inlined_call_operand.hbm [shape: f32[1,32], index: 4, kind: input, shape index: {}]   ;;  %s2632_s5 = inlined_call_operand.hbm [shape: f32[1,32], index: 5, kind: input, shape index: {}]   ;;  %s2633_s6 = inlined_call_operand.hbm [shape: bf16[32,64], index: 6, kind: input, shape index: {}]   ;;  %s2634_s7 = inlined_call_operand.hbm [shape: f32[1,64], index: 7, kind: input, shape index: {}]   ;;  %s2635_s8 = inlined_call_operand.hbm [shape: bf16[64,32], index: 8, kind: input, shape index: {}]   ;;  %s2636_s9 = inlined_call_operand.hbm [shape: f32[1,32], index: 9, kind: input, shape index: {}]   ;;  %s2637_s10 = inlined_call_operand.hbm [shape: f32[1,32], index: 10, kind: input, shape index: {}]   ;;  %s2638_s11 = inlined_call_operand.hbm [shape: f32[1,32], index: 11, kind: input, shape index: {}]   ;;  %s2639_s12 = inlined_call_operand.hbm [shape: f32[16,32], index: 12, kind: output, shape index: {}]  }
   0x1   :  { %18 = vsyncpa [#allocation7], 0 }
   0x2   :  { %19 = vsyncpa [#allocation10], 0 }
   0x3   :  { %20 = vsyncpa [#allocation13], 0 }
   0x4   :  { %21 = vsyncpa [#allocation16], 0 }
   0x5   :  { %22 = vsyncpa [#allocation19], 0 }
   0x6   :  { %23 = vsyncpa [#allocation22], 0 }
   0x7   :  { %24 = vsyncpa [#allocation5], 0  ;;  %s2162_s21 = smov [#allocation6]   ;;  %s1860_s25 = scalar_lea.hbm %s2628_s1, 256 }
   0x8   :  { %s42_s22 = sshll.u32 %s2162_s21, 4  ;;  %p1861_p0 = scmp.ne.s32.totalorder %s2628_s1, %s1860_s25  ;;  %s43_s22 = int_to_ptr.vmem [resolvable:$true] %s42_s22 }
   0x9   :  { %p1864_p1 = scmp.lt.u32.totalorder %s1860_s25, %s2628_s1 }
   0xb   :  { %p1866_p2 = pnand %p1864_p1, %p1861_p0 }
   0xd   :  { %1869 = shalt.err (!%p1866_p2)
}
   0xe   :  { %s1870_s30 = scalar_lea.vmem %s43_s22, 256  ;;  %p1875_p4 = scmp.lt.s32.totalorder %s43_s22, %s43_s22 }
   0xf   :  { %p1871_p3 = scmp.ne.s32.totalorder %s43_s22, %s1870_s30  ;;  %p1876_p5 = scmp.lt.s32.totalorder %s1870_s30, %s1870_s30 }
  0x11   :  { %p1877_p6 = por %p1876_p5, %p1875_p4 }
  0x13   :  { %p1878_p7 = pnand %p1877_p6, %p1871_p3 }
  0x15   :  { %1881 = shalt.err (!%p1878_p7)
}
  0x16   :  { %s2163_s13 = smov 128   ;;  %s2164_s14 = smov 8  }
  0x17   :  { %48 = dma.hbm_to_vmem [thread:$0]  %s2628_s1, 256, %s43_s22, [#allocation7], %s2163_s13, %s2163_s13, %s2164_s14  }
  0x18   :  { %s2165_s17 = smov [#allocation9]   ;;  %s2166_s19 = smov [#allocation12]  }
  0x19   :  { %s66_s18 = sshll.u32 %s2165_s17, 4  ;;  %s89_s20 = sshll.u32 %s2166_s19, 4  ;;  %s67_s18 = int_to_ptr.vmem [resolvable:$true] %s66_s18  ;;  %s90_s20 = int_to_ptr.vmem [resolvable:$true] %s89_s20 }
  0x1a   :  { %s1882_s24 = scalar_lea.hbm %s2630_s3, 256 }
  0x1b   :  { %p1883_p8 = scmp.ne.s32.totalorder %s2630_s3, %s1882_s24  ;;  %p1886_p9 = scmp.lt.u32.totalorder %s1882_s24, %s2630_s3 }
  0x1d   :  { %p1888_p10 = pnand %p1886_p9, %p1883_p8 }
  0x1f   :  { %1891 = shalt.err (!%p1888_p10)
}
  0x20   :  { %s1892_s1 = scalar_lea.vmem %s67_s18, 256  ;;  %p1897_p12 = scmp.lt.s32.totalorder %s67_s18, %s67_s18 }
  0x21   :  { %p1893_p11 = scmp.ne.s32.totalorder %s67_s18, %s1892_s1  ;;  %p1898_p13 = scmp.lt.s32.totalorder %s1892_s1, %s1892_s1 }
  0x23   :  { %p1899_p0 = por %p1898_p13, %p1897_p12 }
  0x25   :  { %p1900_p1 = pnand %p1899_p0, %p1893_p11 }
  0x27   :  { %1903 = shalt.err (!%p1900_p1)
}
  0x28   :  { %s2167_s22 = smov 64   ;;  %s2168_s29 = smov 4  }
  0x29   :  { %72 = dma.hbm_to_vmem [thread:$0]  %s2630_s3, 256, %s67_s18, [#allocation10], %s2167_s22, %s2167_s22, %s2168_s29  }
  0x2a   :  { %s1904_s19 = scalar_lea.hbm %s2632_s5, 16 }
  0x2b   :  { %p1905_p2 = scmp.ne.s32.totalorder %s2632_s5, %s1904_s19  ;;  %p1908_p3 = scmp.lt.u32.totalorder %s1904_s19, %s2632_s5 }
  0x2d   :  { %p1910_p4 = pnand %p1908_p3, %p1905_p2 }
  0x2f   :  { %1913 = shalt.err (!%p1910_p4)
}
  0x30   :  { %s1914_s26 = scalar_lea.vmem %s90_s20, 16  ;;  %s1918_s27 = scalar_lea.vmem %s90_s20, 32 }
  0x31   :  { %p1915_p5 = scmp.ne.s32.totalorder %s90_s20, %s1914_s26  ;;  %p1919_p6 = scmp.lt.s32.totalorder %s90_s20, %s90_s20 }
  0x32   :  { %p1920_p7 = scmp.lt.s32.totalorder %s1918_s27, %s1914_s26 }
  0x34   :  { %p1921_p8 = por %p1920_p7, %p1919_p6 }
  0x36   :  { %p1922_p9 = pnand %p1921_p8, %p1915_p5 }
  0x38   :  { %1925 = shalt.err (!%p1922_p9)
}
  0x39   :  { %92 = dma.hbm_to_vmem [thread:$0]  %s2632_s5, 16, %s90_s20, [#allocation13]  }
  0x3a   :  { %s2169_s28 = smov [#allocation15]   ;;  %s2170_s30 = smov [#allocation18]  }
  0x3b   :  { %s111_s1 = sshll.u32 %s2169_s28, 4  ;;  %s133_s15 = sshll.u32 %s2170_s30, 4  ;;  %s112_s1 = int_to_ptr.vmem [resolvable:$true] %s111_s1  ;;  %s134_s15 = int_to_ptr.vmem [resolvable:$true] %s133_s15 }
  0x3c   :  { %s1926_s19 = scalar_lea.hbm %s2634_s7, 16 }
  0x3d   :  { %p1927_p10 = scmp.ne.s32.totalorder %s2634_s7, %s1926_s19  ;;  %p1930_p11 = scmp.lt.u32.totalorder %s1926_s19, %s2634_s7 }
  0x3f   :  { %p1932_p12 = pnand %p1930_p11, %p1927_p10 }
  0x41   :  { %1935 = shalt.err (!%p1932_p12)
}
  0x42   :  { %s1936_s5 = scalar_lea.vmem %s112_s1, 16  ;;  %s1940_s20 = scalar_lea.vmem %s112_s1, 32 }
  0x43   :  { %p1937_p13 = scmp.ne.s32.totalorder %s112_s1, %s1936_s5  ;;  %p1941_p0 = scmp.lt.s32.totalorder %s112_s1, %s112_s1 }
  0x44   :  { %p1942_p1 = scmp.lt.s32.totalorder %s1940_s20, %s1936_s5 }
  0x46   :  { %p1943_p2 = por %p1942_p1, %p1941_p0 }
  0x48   :  { %p1944_p3 = pnand %p1943_p2, %p1937_p13 }
  0x4a   :  { %1947 = shalt.err (!%p1944_p3)
}
  0x4b   :  { %114 = dma.hbm_to_vmem [thread:$0]  %s2634_s7, 16, %s112_s1, [#allocation16]  }
  0x4c   :  { %s1948_s28 = scalar_lea.hbm %s2636_s9, 16 }
  0x4d   :  { %p1949_p4 = scmp.ne.s32.totalorder %s2636_s9, %s1948_s28  ;;  %p1952_p5 = scmp.lt.u32.totalorder %s1948_s28, %s2636_s9 }
  0x4f   :  { %p1954_p6 = pnand %p1952_p5, %p1949_p4 }
  0x51   :  { %1957 = shalt.err (!%p1954_p6)
}
  0x52   :  { %s1958_s21 = scalar_lea.vmem %s134_s15, 16  ;;  %s1962_s23 = scalar_lea.vmem %s134_s15, 32 }
  0x53   :  { %p1959_p7 = scmp.ne.s32.totalorder %s134_s15, %s1958_s21  ;;  %p1963_p8 = scmp.lt.s32.totalorder %s134_s15, %s134_s15 }
  0x54   :  { %p1964_p9 = scmp.lt.s32.totalorder %s1962_s23, %s1958_s21 }
  0x56   :  { %p1965_p10 = por %p1964_p9, %p1963_p8 }
  0x58   :  { %p1966_p11 = pnand %p1965_p10, %p1959_p7 }
  0x5a   :  { %1969 = shalt.err (!%p1966_p11)
}
  0x5b   :  { %136 = dma.hbm_to_vmem [thread:$0]  %s2636_s9, 16, %s134_s15, [#allocation19]  }
  0x5c   :  { %s2171_s24 = smov [#allocation3]   ;;  %s2172_s5 = smov [#allocation8]  }
  0x5d   :  { %s30_s25 = sshll.u32 %s2171_s24, 4  ;;  %s54_s20 = sshll.u32 %s2172_s5, 4  ;;  %s31_s25 = int_to_ptr.vmem [resolvable:$true] %s30_s25  ;;  %s55_s20 = int_to_ptr.vmem [resolvable:$true] %s54_s20 }
  0x5e   :  { %s1970_s3 = scalar_lea.hbm %s2627_s0, 256 }
  0x5f   :  { %p1971_p12 = scmp.ne.s32.totalorder %s2627_s0, %s1970_s3  ;;  %p1974_p13 = scmp.lt.u32.totalorder %s1970_s3, %s2627_s0 }
  0x61   :  { %p1976_p0 = pnand %p1974_p13, %p1971_p12 }
  0x63   :  { %1979 = shalt.err (!%p1976_p0)
}
  0x64   :  { %s1980_s9 = scalar_lea.vmem %s31_s25, 256  ;;  %p1985_p2 = scmp.lt.s32.totalorder %s31_s25, %s31_s25 }
  0x65   :  { %p1981_p1 = scmp.ne.s32.totalorder %s31_s25, %s1980_s9  ;;  %p1986_p3 = scmp.lt.s32.totalorder %s1980_s9, %s1980_s9 }
  0x67   :  { %p1987_p4 = por %p1986_p3, %p1985_p2 }
  0x69   :  { %p1988_p5 = pnand %p1987_p4, %p1981_p1 }
  0x6b   :  { %1991 = shalt.err (!%p1988_p5)
}
  0x6c   :  { %36 = dma.hbm_to_vmem [thread:$0]  %s2627_s0, 256, %s31_s25, [#allocation4], %s2163_s13, %s2163_s13, %s2164_s14  }
  0x6d   :  { %s1992_s23 = scalar_lea.hbm %s2629_s2, 256 }
  0x6e   :  { %p1993_p6 = scmp.ne.s32.totalorder %s2629_s2, %s1992_s23  ;;  %p1996_p7 = scmp.lt.u32.totalorder %s1992_s23, %s2629_s2 }
  0x70   :  { %p1998_p8 = pnand %p1996_p7, %p1993_p6 }
  0x72   :  { %2001 = shalt.err (!%p1998_p8)
}
  0x73   :  { %s2002_s26 = scalar_lea.vmem %s55_s20, 256  ;;  %p2007_p10 = scmp.lt.s32.totalorder %s55_s20, %s55_s20 }
  0x74   :  { %p2003_p9 = scmp.ne.s32.totalorder %s55_s20, %s2002_s26  ;;  %p2008_p11 = scmp.lt.s32.totalorder %s2002_s26, %s2002_s26 }
  0x76   :  { %p2009_p12 = por %p2008_p11, %p2007_p10 }
  0x78   :  { %p2010_p13 = pnand %p2009_p12, %p2003_p9 }
  0x7a   :  { %2013 = shalt.err (!%p2010_p13)
}
  0x7b   :  { %60 = dma.hbm_to_vmem [thread:$0]  %s2629_s2, 256, %s55_s20, [#allocation7], %s2167_s22, %s2167_s22, %s2168_s29  }
  0x7c   :  { %s2173_s27 = smov [#allocation11]   ;;  %s2174_s18 = smov [#allocation14]  }
  0x7d   :  { %s79_s3 = sshll.u32 %s2173_s27, 4  ;;  %s98_s28 = sshll.u32 %s2174_s18, 4  ;;  %s80_s3 = int_to_ptr.vmem [resolvable:$true] %s79_s3  ;;  %s99_s28 = int_to_ptr.vmem [resolvable:$true] %s98_s28 }
  0x7e   :  { %s2014_s9 = scalar_lea.hbm %s2631_s4, 16 }
  0x7f   :  { %p2015_p0 = scmp.ne.s32.totalorder %s2631_s4, %s2014_s9  ;;  %p2018_p1 = scmp.lt.u32.totalorder %s2014_s9, %s2631_s4 }
  0x81   :  { %p2020_p2 = pnand %p2018_p1, %p2015_p0 }
  0x83   :  { %2023 = shalt.err (!%p2020_p2)
}
  0x84   :  { %s2024_s2 = scalar_lea.vmem %s80_s3, 16  ;;  %s2028_s20 = scalar_lea.vmem %s80_s3, 32 }
  0x85   :  { %p2025_p3 = scmp.ne.s32.totalorder %s80_s3, %s2024_s2  ;;  %p2029_p4 = scmp.lt.s32.totalorder %s80_s3, %s80_s3 }
  0x86   :  { %p2030_p5 = scmp.lt.s32.totalorder %s2028_s20, %s2024_s2 }
  0x88   :  { %p2031_p6 = por %p2030_p5, %p2029_p4 }
  0x8a   :  { %p2032_p7 = pnand %p2031_p6, %p2025_p3 }
  0x8c   :  { %2035 = shalt.err (!%p2032_p7)
}
  0x8d   :  { %82 = dma.hbm_to_vmem [thread:$0]  %s2631_s4, 16, %s80_s3, [#allocation10]  }
  0x8e   :  { %s2036_s5 = scalar_lea.hbm %s2633_s6, 256 }
  0x8f   :  { %p2037_p8 = scmp.ne.s32.totalorder %s2633_s6, %s2036_s5  ;;  %p2040_p9 = scmp.lt.u32.totalorder %s2036_s5, %s2633_s6 }
  0x91   :  { %p2042_p10 = pnand %p2040_p9, %p2037_p8 }
  0x93   :  { %2045 = shalt.err (!%p2042_p10)
}
  0x94   :  { %s2046_s18 = scalar_lea.vmem %s99_s28, 256  ;;  %p2051_p12 = scmp.lt.s32.totalorder %s99_s28, %s99_s28 }
  0x95   :  { %p2047_p11 = scmp.ne.s32.totalorder %s99_s28, %s2046_s18  ;;  %p2052_p13 = scmp.lt.s32.totalorder %s2046_s18, %s2046_s18 }
  0x97   :  { %p2053_p0 = por %p2052_p13, %p2051_p12 }
  0x99   :  { %p2054_p1 = pnand %p2053_p0, %p2047_p11 }
  0x9b   :  { %2057 = shalt.err (!%p2054_p1)
}
  0x9c   :  { %104 = dma.hbm_to_vmem [thread:$0]  %s2633_s6, 256, %s99_s28, [#allocation13], %s2167_s22, %s2167_s22, %s2168_s29  }
  0x9d   :  { %s2175_s30 = smov [#allocation17]   ;;  %s2176_s9 = smov [#allocation20]  }
  0x9e   :  { %s120_s16 = sshll.u32 %s2175_s30, 4  ;;  %s143_s15 = sshll.u32 %s2176_s9, 4  ;;  %s121_s16 = int_to_ptr.vmem [resolvable:$true] %s120_s16  ;;  %s144_s15 = int_to_ptr.vmem [resolvable:$true] %s143_s15 }
  0x9f   :  { %s2058_s21 = scalar_lea.hbm %s2635_s8, 512 }
  0xa0   :  { %p2059_p2 = scmp.ne.s32.totalorder %s2635_s8, %s2058_s21  ;;  %p2062_p3 = scmp.lt.u32.totalorder %s2058_s21, %s2635_s8 }
  0xa2   :  { %p2064_p4 = pnand %p2062_p3, %p2059_p2 }
  0xa4   :  { %2067 = shalt.err (!%p2064_p4)
}
  0xa5   :  { %s2068_s6 = scalar_lea.vmem %s121_s16, 512  ;;  %p2073_p6 = scmp.lt.s32.totalorder %s121_s16, %s121_s16 }
  0xa6   :  { %p2069_p5 = scmp.ne.s32.totalorder %s121_s16, %s2068_s6  ;;  %p2074_p7 = scmp.lt.s32.totalorder %s2068_s6, %s2068_s6 }
  0xa8   :  { %p2075_p8 = por %p2074_p7, %p2073_p6 }
  0xaa   :  { %p2076_p9 = pnand %p2075_p8, %p2069_p5 }
  0xac   :  { %2079 = shalt.err (!%p2076_p9)
}
  0xad   :  { %126 = dma.hbm_to_vmem [thread:$0]  %s2635_s8, 512, %s121_s16, [#allocation16], %s2167_s22, %s2167_s22, %s2168_s29  }
  0xae   :  { %s2080_s26 = scalar_lea.hbm %s2637_s10, 16 }
  0xaf   :  { %p2081_p10 = scmp.ne.s32.totalorder %s2637_s10, %s2080_s26  ;;  %p2084_p11 = scmp.lt.u32.totalorder %s2080_s26, %s2637_s10 }
  0xb1   :  { %p2086_p12 = pnand %p2084_p11, %p2081_p10 }
  0xb3   :  { %2089 = shalt.err (!%p2086_p12)
}
  0xb4   :  { %s2090_s4 = scalar_lea.vmem %s144_s15, 16  ;;  %s2094_s3 = scalar_lea.vmem %s144_s15, 32 }
  0xb5   :  { %p2091_p13 = scmp.ne.s32.totalorder %s144_s15, %s2090_s4  ;;  %p2095_p0 = scmp.lt.s32.totalorder %s144_s15, %s144_s15 }
  0xb6   :  { %p2096_p1 = scmp.lt.s32.totalorder %s2094_s3, %s2090_s4 }
  0xb8   :  { %p2097_p2 = por %p2096_p1, %p2095_p0 }
  0xba   :  { %p2098_p3 = pnand %p2097_p2, %p2091_p13 }
  0xbc   :  { %2101 = shalt.err (!%p2098_p3)
}
  0xbd   :  { %146 = dma.hbm_to_vmem [thread:$0]  %s2637_s10, 16, %s144_s15, [#allocation19]  }
  0xbe   :  { %s2177_s30 = smov [#allocation21]   ;;  %s2102_s19 = scalar_lea.hbm %s2638_s11, 16 }
  0xbf   :  { %s153_s16 = sshll.u32 %s2177_s30, 4  ;;  %p2103_p4 = scmp.ne.s32.totalorder %s2638_s11, %s2102_s19  ;;  %s154_s16 = int_to_ptr.vmem [resolvable:$true] %s153_s16 }
  0xc0   :  { %p2106_p5 = scmp.lt.u32.totalorder %s2102_s19, %s2638_s11 }
  0xc2   :  { %p2108_p6 = pnand %p2106_p5, %p2103_p4 }
  0xc4   :  { %2111 = shalt.err (!%p2108_p6)
}
  0xc5   :  { %s2112_s7 = scalar_lea.vmem %s154_s16, 16  ;;  %s2116_s10 = scalar_lea.vmem %s154_s16, 32 }
  0xc6   :  { %p2113_p7 = scmp.ne.s32.totalorder %s154_s16, %s2112_s7  ;;  %p2117_p8 = scmp.lt.s32.totalorder %s154_s16, %s154_s16 }
  0xc7   :  { %p2118_p9 = scmp.lt.s32.totalorder %s2116_s10, %s2112_s7 }
  0xc9   :  { %p2119_p10 = por %p2118_p9, %p2117_p8 }
  0xcb   :  { %p2120_p11 = pnand %p2119_p10, %p2113_p7 }
  0xcd   :  { %2123 = shalt.err (!%p2120_p11)
}
  0xce   :  { %156 = dma.hbm_to_vmem [thread:$0]  %s2638_s11, 16, %s154_s16, [#allocation22]  }
  0xcf   :  { %2146 = dma.done.wait [#allocation4], 256  }
  0xd0   :  { %2147 = vsyncadd [#allocation4], 4294967040 }
  0xd1   :  { %2148 = dma.done.wait [#allocation7], 512  }
  0xd2   :  { %2149 = vsyncadd [#allocation7], 4294966784 }
  0xd3   :  { %2150 = dma.done.wait [#allocation10], 272  }
  0xd4   :  { %2151 = vsyncadd [#allocation10], 4294967024 }
  0xd5   :  { %2152 = dma.done.wait [#allocation13], 272  }
  0xd6   :  { %2153 = vsyncadd [#allocation13], 4294967024 }
  0xd7   :  { %2154 = dma.done.wait [#allocation16], 528  }
  0xd8   :  { %2155 = vsyncadd [#allocation16], 4294966768 }
  0xd9   :  { %2156 = dma.done.wait [#allocation19], 32  }
  0xda   :  { %2157 = vsyncadd [#allocation19], 4294967264 }
  0xdb   :  { %2158 = dma.done.wait [#allocation22], 16  }
  0xdc   :  { %2159 = vsyncadd [#allocation22], 4294967280  ;;  %v2178_v0 = vmov 0.0   ;;  %vm2179_vm0 = vmmov 0   ;;  %v1809_v1 = vld [vmem:[#allocation8] sm:$0xff]   ;;  %v1810_v2 = vld [vmem:[#allocation8 + $0x8] sm:$0xff]  }
  0xdd   :  { %1643 = vmatprep.subr.bf16.mxu0 %v2178_v0  ;;  %1647 = vmatprep.mubr.msk.bf16.mxu0 %vm2179_vm0, %v2178_v0  ;;  %v2427_v3 = vld [vmem:[#allocation3] sm:$0xff]  ;;  %v2429_v4 = vld [vmem:[#allocation3 + $0x8] sm:$0xff]  ;;  %vm213_vm1 = vcmask 261120   ;;  %v260_v10 = vld [vmem:[#allocation6] sm:$0xff]  ;;  %s2180_s11 = smov 96   ;;  %v2181_v12 = vmov 0  }
  0xde   :  { %1651 = vmatprep.subr.bf16.mxu1 %v2178_v0  ;;  %1653 = vmatprep.mubr.msk.bf16.mxu1 %vm2179_vm0, %v2178_v0  ;;  %v196_v5 = vpack.c.bf16 %v2429_v4, %v2427_v3  ;;  %v261_v14 = vld [vmem:[#allocation6 + $0x8] sm:$0xff]  ;;  %vm275_vm2 = vcmask 64512   ;;  %s2182_s28 = smov 88   ;;  %s2183_s1 = smov 120   ;;  %vm400_vm3 = vcmask 1043456   ;;  %vm494_vm4 = vcmask 60416  }
  0xdf   :  { %1644 = vmatpush3.bf16.msra.mxu0 %v1809_v1  ;;  %1807 = vset.pattern.permute.xlu1 %v2181_v12  ;;  %s2185_s24 = smov 80   ;;  %s2186_s5 = smov 112   ;;  %vm731_vm5 = vcmask 126016   ;;  %vm968_vm6 = vcmask 191616   ;;  %vm1205_vm7 = vcmask 257216   ;;  %vm1432_vm8 = vcmask 523264  }
  0xe0   :  { %1645 = vmatprep.subr.bf16.mxu0 %v2178_v0  ;;  %264 = vperm.xlu1 %1807, %v260_v10   ;;  %s2187_s26 = smov 48   ;;  %s2188_s0 = smov 72  }
  0xe1   :  { %1808 = vset.pattern.permute.xlu0 %v2181_v12  ;;  %s2189_s25 = smov 104   ;;  %s2190_s27 = smov 40  }
  0xe2   :  { %s2191_s18 = smov 16   ;;  %s2192_s4 = smov 24  }
  0xe3   :  { %1646 = vmatpush3.bf16.msra.mxu0 %v1810_v2  ;;  %s2193_s3 = smov [#allocation23]  }
  0xe4   :  { %1657 = vmatprep.subr.bf16.mxu0 %v2178_v0  ;;  %269 = vperm.xlu1 %1807, %v261_v14   ;;  %s1530_s8 = sshll.u32 %s2193_s3, 4  ;;  %s1531_s8 = int_to_ptr.vmem [resolvable:$true] %s1530_s8 }
  0xe5   :  { %s2124_s29 = scalar_lea.vmem %s1531_s8, 256  ;;  %p2129_p13 = scmp.lt.s32.totalorder %s1531_s8, %s1531_s8 }
  0xe6   :  { %1648 = vmatmul.mubr.msk.bf16.vlgmr.msra.gmra.mrb[0].mxu0 %vm213_vm1, %v196_v5  ;;  %p2125_p12 = scmp.ne.s32.totalorder %s1531_s8, %s2124_s29  ;;  %p2130_p0 = scmp.lt.s32.totalorder %s2124_s29, %s2124_s29 }
  0xe7   :  { %1659 = vmatprep.mubr.msk.bf16.mxu0 %vm2179_vm0, %v2178_v0 }
  0xe8   :  { %p2131_p1 = por %p2130_p0, %p2129_p13 }
  0xea   :  { %p2132_p2 = pnand %p2131_p1, %p2125_p12 }
 0x15f   :  { %v2456_v19 = vpop.permute.xlu1 %264 }
 0x163   :  { %v2460_v26 = vpop.permute.xlu1 %269 }
 0x1b9   :  { %v251_v6 = vpop.f32.mrb[0].mxu0 }
 0x1ba   :  { %v2438_v7 = vpack.c.bf16 %v251_v6, %v251_v6  ;;  %v1649_v8 = vpop.f32.mrb[1].mxu0 }
 0x1bb   :  { %v254_v9 = vpop.f32.mrb[2].mxu0 }
 0x1bc   :  { %273 = vrot.lane.b32.xlu0 %v2438_v7, %s2180_s11  ;;  %v1650_v11 = vpop.f32.mrb[3].mxu0  ;;  %v2441_v13 = vpack.c.bf16 %v254_v9, %v254_v9 }
 0x1c0   :  { %323 = vrot.lane.b32.xlu0 %v2441_v13, %s2180_s11 }
 0x22e   :  { %v274_v15 = vpop.permute.xlu0 %273 }
 0x22f   :  { %v280_v16 = vsel %vm275_vm2, %v274_v15, 0 }
 0x230   :  { %1652 = vmatpush3.bf16.xpose.msra.mxu1 %v280_v16 }
 0x231   :  { %1663 = vmatprep.subr.bf16.mxu1 %v2178_v0 }
 0x232   :  { %v324_v17 = vpop.permute.xlu0 %323 }
 0x233   :  { %v329_v18 = vsel %vm275_vm2, %v324_v17, 0 }
 0x234   :  { %1658 = vmatpush3.bf16.xpose.msra.mxu0 %v329_v18 }
 0x235   :  { %1669 = vmatprep.subr.bf16.mxu0 %v2178_v0 }
 0x237   :  { %1654 = vmatmul.mubr.msk.bf16.vlgmr.msra.gmra.mrb[0].mxu1 %vm275_vm2, %v2438_v7 }
 0x238   :  { %1665 = vmatprep.mubr.msk.bf16.mxu1 %vm2179_vm0, %v2178_v0 }
 0x23b   :  { %1660 = vmatmul.mubr.msk.bf16.vlgmr.msra.gmra.mrb[4].mxu0 %vm275_vm2, %v2441_v13 }
 0x23c   :  { %1671 = vmatprep.mubr.msk.bf16.mxu0 %vm2179_vm0, %v2178_v0 }
 0x30a   :  { %v316_v20 = vpop.f32.mrb[0].mxu1 }
 0x30b   :  { %v317_v21 = vadd.f32 %v316_v20, %v2456_v19  ;;  %v1655_v22 = vpop.f32.mrb[1].mxu1 }
 0x30c   :  { %v319_v23 = vpop.f32.mrb[2].mxu1 }
 0x30d   :  { %v1656_v24 = vpop.f32.mrb[3].mxu1  ;;  %v371_v25 = vsel %vm275_vm2, %v317_v21, -inf }
 0x30e   :  { %372 = vmax.xlane.f32.xlu0 %v371_v25  ;;  %v365_v27 = vpop.f32.mrb[4].mxu0 }
 0x30f   :  { %v366_v28 = vadd.f32 %v365_v27, %v2460_v26  ;;  %v1661_v29 = vpop.f32.mrb[5].mxu0 }
 0x310   :  { %v368_v30 = vpop.f32.mrb[6].mxu0 }
 0x311   :  { %v1662_v31 = vpop.f32.mrb[7].mxu0  ;;  %v374_v32 = vsel %vm275_vm2, %v366_v28, -inf }
 0x312   :  { %375 = vmax.xlane.f32.xlu1 %v374_v32 }
 0x323   :  { %395 = vrot.lane.b32.xlu1 %v2438_v7, %s2167_s22 }
 0x327   :  { %499 = vrot.lane.b32.xlu1 %v2438_v7, %s2182_s28 }
 0x32b   :  { %549 = vrot.lane.b32.xlu1 %v2441_v13, %s2182_s28 }
 0x32f   :  { %547 = vrot.lane.b32.xlu1 %v2441_v13, %s2183_s1 }
 0x39b   :  { %v373_v33 = vpop.xlane.xlu0 %372 }
 0x39c   :  { %v377_v34 = vsub.f32 %v317_v21, %v373_v33 }
 0x39e   :  { %v379_v35 = vmul.f32 1.442695, %v377_v34 }
 0x39f   :  { %v376_v36 = vpop.xlane.xlu1 %375 }
 0x3a0   :  { %1820 = vpow2.f32 %v379_v35  ;;  %v378_v37 = vsub.f32 %v366_v28, %v376_v36 }
 0x3a2   :  { %v381_v38 = vmul.f32 1.442695, %v378_v37 }
 0x3a3   :  { %v396_v39 = vpop.permute.xlu1 %395 }
 0x3a4   :  { %1822 = vpow2.f32 %v381_v38  ;;  %v402_v40 = vsel %vm400_vm3, %v396_v39, 0 }
 0x3a5   :  { %1664 = vmatpush3.bf16.msra.mxu1 %v402_v40 }
 0x3a6   :  { %1675 = vmatprep.subr.bf16.mxu1 %v2178_v0 }
 0x3a7   :  { %v500_v50 = vpop.permute.xlu1 %499 }
 0x3a8   :  { %v505_v54 = vsel %vm275_vm2, %v500_v50, 0 }
 0x3aa   :  { %v1821_v41 = vpop.eup %1820 }
 0x3ab   :  { %v383_v42 = vsel %vm275_vm2, %v1821_v41, 0.0  ;;  %v550_v56 = vpop.permute.xlu1 %549 }
 0x3ac   :  { %384 = vadd.xlane.f32.xlu0 %v383_v42  ;;  %v555_v58 = vsel %vm275_vm2, %v550_v56, 0 }
 0x3ae   :  { %v1823_v43 = vpop.eup %1822 }
 0x3af   :  { %v386_v44 = vsel %vm275_vm2, %v1823_v43, 0.0  ;;  %v548_v60 = vpop.permute.xlu1 %547 }
 0x3b0   :  { %387 = vadd.xlane.f32.xlu0 %v386_v44 }
 0x3c6   :  { %444 = vrot.lane.b32.xlu0 %v2441_v13, %s2167_s22  ;;  %s2184_s22 = smov 56  }
 0x3ca   :  { %497 = vrot.lane.b32.xlu0 %v2438_v7, %s2183_s1 }
 0x439   :  { %v385_v45 = vpop.xlane.xlu0 %384 }
 0x43a   :  { %1824 = vrcp.f32 %v385_v45 }
 0x43d   :  { %v388_v46 = vpop.xlane.xlu0 %387 }
 0x43e   :  { %1826 = vrcp.f32 %v388_v46 }
 0x441   :  { %v445_v47 = vpop.permute.xlu0 %444 }
 0x442   :  { %v450_v48 = vsel %vm400_vm3, %v445_v47, 0 }
 0x443   :  { %1670 = vmatpush3.bf16.msra.mxu0 %v450_v48 }
 0x444   :  { %v1825_v49 = vpop.eup %1824  ;;  %1681 = vmatprep.subr.bf16.mxu0 %v2178_v0 }
 0x445   :  { %v391_v51 = vmul.f32 %v1825_v49, %v1821_v41  ;;  %v498_v59 = vpop.permute.xlu0 %497 }
 0x447   :  { %v393_v52 = vpack.c.bf16 %v391_v51, %v391_v51 }
 0x448   :  { %v1827_v53 = vpop.eup %1826 }
 0x449   :  { %v392_v55 = vmul.f32 %v1827_v53, %v1823_v43  ;;  %1666 = vmatmul.mubr.msk.bf16.vlgmr.msra.gmra.mrb[4].mxu1 %vm275_vm2, %v393_v52 }
 0x44a   :  { %1676 = vmatpush3.bf16.xpose.msra.mxu1 %v505_v54  ;;  %1677 = vmatprep.mubr.msk.bf16.mxu1 %vm2179_vm0, %v2178_v0 }
 0x44b   :  { %v394_v57 = vpack.c.bf16 %v392_v55, %v392_v55  ;;  %1687 = vmatprep.subr.bf16.mxu1 %v2178_v0 }
 0x44d   :  { %1672 = vmatmul.mubr.msk.bf16.vlgmr.msra.gmra.mrb[8].mxu0 %vm275_vm2, %v394_v57 }
 0x44e   :  { %1682 = vmatpush3.bf16.xpose.msra.mxu0 %v555_v58  ;;  %1683 = vmatprep.mubr.msk.bf16.mxu0 %vm2179_vm0, %v2178_v0 }
 0x44f   :  { %1693 = vmatprep.subr.bf16.mxu0 %v2178_v0 }
 0x451   :  { %1678 = vmatmul.mubr.msk.bf16.vlgmr.msra.gmra.mrb[8].mxu1 %vm275_vm2, %v498_v59 }
 0x452   :  { %1689 = vmatprep.mubr.msk.bf16.mxu1 %vm2179_vm0, %v2178_v0 }
 0x455   :  { %1684 = vmatmul.mubr.msk.bf16.vlgmr.msra.gmra.mrb[12].mxu0 %vm275_vm2, %v548_v60 }
 0x456   :  { %1695 = vmatprep.mubr.msk.bf16.mxu0 %vm2179_vm0, %v2178_v0 }
 0x51c   :  { %v438_v61 = vpop.f32.mrb[4].mxu1 }
 0x51d   :  { %v492_v62 = vpack.c.bf16 %v438_v61, %v438_v61  ;;  %v1667_v63 = vpop.f32.mrb[5].mxu1 }
 0x51e   :  { %v441_v1 = vpop.f32.mrb[6].mxu1 }
 0x51f   :  { %495 = vst.msk [vmem:[#allocation2] sm:$0xf] %vm494_vm4, %v492_v62  ;;  %v1668_v2 = vpop.f32.mrb[7].mxu1 }
 0x520   :  { %v486_v5 = vpop.f32.mrb[8].mxu0 }
 0x521   :  { %v493_v6 = vpack.c.bf16 %v486_v5, %v486_v5  ;;  %v1673_v8 = vpop.f32.mrb[9].mxu0 }
 0x522   :  { %v489_v9 = vpop.f32.mrb[10].mxu0 }
 0x523   :  { %496 = vst.msk [vmem:[#allocation2 + $0x4] sm:$0xf] %vm494_vm4, %v493_v6  ;;  %v1674_v10 = vpop.f32.mrb[11].mxu0 }
 0x524   :  { %v541_v11 = vpop.f32.mrb[8].mxu1 }
 0x525   :  { %v542_v12 = vadd.f32 %v541_v11, %v2456_v19  ;;  %v1679_v14 = vpop.f32.mrb[9].mxu1 }
 0x526   :  { %v544_v15 = vpop.f32.mrb[10].mxu1 }
 0x527   :  { %v1680_v16 = vpop.f32.mrb[11].mxu1  ;;  %v597_v17 = vsel %vm275_vm2, %v542_v12, -inf }
 0x528   :  { %598 = vmax.xlane.f32.xlu0 %v597_v17  ;;  %v591_v18 = vpop.f32.mrb[12].mxu0 }
 0x529   :  { %v592_v20 = vadd.f32 %v591_v18, %v2460_v26  ;;  %v1685_v21 = vpop.f32.mrb[13].mxu0 }
 0x52a   :  { %v594_v22 = vpop.f32.mrb[14].mxu0 }
 0x52b   :  { %v1686_v23 = vpop.f32.mrb[15].mxu0  ;;  %v600_v24 = vsel %vm275_vm2, %v592_v20, -inf }
 0x52c   :  { %601 = vmax.xlane.f32.xlu1 %v600_v24 }
 0x53d   :  { %621 = vrot.lane.b32.xlu1 %v2438_v7, %s2184_s22 }
 0x541   :  { %736 = vrot.lane.b32.xlu1 %v2438_v7, %s2185_s24 }
 0x545   :  { %786 = vrot.lane.b32.xlu1 %v2441_v13, %s2185_s24 }
 0x549   :  { %784 = vrot.lane.b32.xlu1 %v2441_v13, %s2186_s5 }
 0x5b5   :  { %v599_v25 = vpop.xlane.xlu0 %598 }
 0x5b6   :  { %v603_v27 = vsub.f32 %v542_v12, %v599_v25 }
 0x5b8   :  { %v605_v28 = vmul.f32 1.442695, %v603_v27 }
 0x5b9   :  { %v602_v29 = vpop.xlane.xlu1 %601 }
 0x5ba   :  { %1828 = vpow2.f32 %v605_v28  ;;  %v604_v30 = vsub.f32 %v592_v20, %v602_v29 }
 0x5bc   :  { %v607_v31 = vmul.f32 1.442695, %v604_v30 }
 0x5bd   :  { %v622_v32 = vpop.permute.xlu1 %621 }
 0x5be   :  { %1830 = vpow2.f32 %v607_v31  ;;  %v627_v33 = vsel %vm400_vm3, %v622_v32, 0 }
 0x5bf   :  { %1688 = vmatpush3.bf16.msra.mxu1 %v627_v33 }
 0x5c0   :  { %1699 = vmatprep.subr.bf16.mxu1 %v2178_v0 }
 0x5c1   :  { %v737_v43 = vpop.permute.xlu1 %736 }
 0x5c2   :  { %v742_v47 = vsel %vm275_vm2, %v737_v43, 0 }
 0x5c4   :  { %v1829_v34 = vpop.eup %1828 }
 0x5c5   :  { %v609_v35 = vsel %vm275_vm2, %v1829_v34, 0.0  ;;  %v787_v49 = vpop.permute.xlu1 %786 }
 0x5c6   :  { %610 = vadd.xlane.f32.xlu0 %v609_v35  ;;  %v792_v51 = vsel %vm275_vm2, %v787_v49, 0 }
 0x5c8   :  { %v1831_v36 = vpop.eup %1830 }
 0x5c9   :  { %v612_v37 = vsel %vm275_vm2, %v1831_v36, 0.0  ;;  %v785_v53 = vpop.permute.xlu1 %784 }
 0x5ca   :  { %613 = vadd.xlane.f32.xlu0 %v612_v37 }
 0x5e0   :  { %669 = vrot.lane.b32.xlu0 %v2441_v13, %s2184_s22 }
 0x5e4   :  { %734 = vrot.lane.b32.xlu0 %v2438_v7, %s2186_s5 }
 0x653   :  { %v611_v38 = vpop.xlane.xlu0 %610 }
 0x654   :  { %1832 = vrcp.f32 %v611_v38 }
 0x657   :  { %v614_v39 = vpop.xlane.xlu0 %613 }
 0x658   :  { %1834 = vrcp.f32 %v614_v39 }
 0x65b   :  { %v670_v40 = vpop.permute.xlu0 %669 }
 0x65c   :  { %v675_v41 = vsel %vm400_vm3, %v670_v40, 0 }
 0x65d   :  { %1694 = vmatpush3.bf16.msra.mxu0 %v675_v41 }
 0x65e   :  { %v1833_v42 = vpop.eup %1832  ;;  %1705 = vmatprep.subr.bf16.mxu0 %v2178_v0 }
 0x65f   :  { %v617_v44 = vmul.f32 %v1833_v42, %v1829_v34  ;;  %v735_v52 = vpop.permute.xlu0 %734 }
 0x661   :  { %v619_v45 = vpack.c.bf16 %v617_v44, %v617_v44 }
 0x662   :  { %v1835_v46 = vpop.eup %1834 }
 0x663   :  { %v618_v48 = vmul.f32 %v1835_v46, %v1831_v36  ;;  %1690 = vmatmul.mubr.msk.bf16.vlgmr.msra.gmra.mrb[12].mxu1 %vm275_vm2, %v619_v45 }
 0x664   :  { %1700 = vmatpush3.bf16.xpose.msra.mxu1 %v742_v47  ;;  %1701 = vmatprep.mubr.msk.bf16.mxu1 %vm2179_vm0, %v2178_v0 }
 0x665   :  { %v620_v50 = vpack.c.bf16 %v618_v48, %v618_v48  ;;  %1711 = vmatprep.subr.bf16.mxu1 %v2178_v0 }
 0x667   :  { %1696 = vmatmul.mubr.msk.bf16.vlgmr.msra.gmra.mrb[16].mxu0 %vm275_vm2, %v620_v50 }
 0x668   :  { %1706 = vmatpush3.bf16.xpose.msra.mxu0 %v792_v51  ;;  %1707 = vmatprep.mubr.msk.bf16.mxu0 %vm2179_vm0, %v2178_v0 }
 0x669   :  { %1717 = vmatprep.subr.bf16.mxu0 %v2178_v0 }
 0x66b   :  { %1702 = vmatmul.mubr.msk.bf16.vlgmr.msra.gmra.mrb[16].mxu1 %vm275_vm2, %v735_v52 }
 0x66c   :  { %1713 = vmatprep.mubr.msk.bf16.mxu1 %vm2179_vm0, %v2178_v0 }
 0x66f   :  { %1708 = vmatmul.mubr.msk.bf16.vlgmr.msra.gmra.mrb[20].mxu0 %vm275_vm2, %v785_v53 }
 0x670   :  { %1719 = vmatprep.mubr.msk.bf16.mxu0 %vm2179_vm0, %v2178_v0 }
 0x736   :  { %v2526_v54 = vpop.f32.mrb[12].mxu1 }
 0x737   :  { %v1691_v55 = vpop.f32.mrb[13].mxu1 }
 0x738   :  { %v666_v56 = vpop.f32.mrb[14].mxu1 }
 0x739   :  { %v1692_v57 = vpop.f32.mrb[15].mxu1 }
 0x73a   :  { %v2528_v58 = vpop.f32.mrb[16].mxu0 }
 0x73b   :  { %v1697_v59 = vpop.f32.mrb[17].mxu0 }
 0x73c   :  { %v714_v60 = vpop.f32.mrb[18].mxu0 }
 0x73d   :  { %v1698_v61 = vpop.f32.mrb[19].mxu0 }
 0x73e   :  { %v778_v62 = vpop.f32.mrb[16].mxu1 }
 0x73f   :  { %v779_v63 = vadd.f32 %v778_v62, %v2456_v19  ;;  %v1703_v1 = vpop.f32.mrb[17].mxu1 }
 0x740   :  { %v781_v2 = vpop.f32.mrb[18].mxu1 }
 0x741   :  { %v1704_v5 = vpop.f32.mrb[19].mxu1  ;;  %v834_v6 = vsel %vm275_vm2, %v779_v63, -inf }
 0x742   :  { %835 = vmax.xlane.f32.xlu0 %v834_v6  ;;  %v828_v8 = vpop.f32.mrb[20].mxu0  ;;  %v1592_v6 = vpack.c.bf16 %v2528_v58, %v2528_v58 }
 0x743   :  { %v829_v9 = vadd.f32 %v828_v8, %v2460_v26  ;;  %v1709_v10 = vpop.f32.mrb[21].mxu0 }
 0x744   :  { %v831_v11 = vpop.f32.mrb[22].mxu0 }
 0x745   :  { %v1710_v12 = vpop.f32.mrb[23].mxu0  ;;  %v837_v14 = vsel %vm275_vm2, %v829_v9, -inf }
 0x746   :  { %838 = vmax.xlane.f32.xlu1 %v837_v14 }
 0x757   :  { %858 = vrot.lane.b32.xlu1 %v2438_v7, %s2187_s26 }
 0x75b   :  { %973 = vrot.lane.b32.xlu1 %v2438_v7, %s2188_s0 }
 0x75f   :  { %1023 = vrot.lane.b32.xlu1 %v2441_v13, %s2188_s0 }
 0x763   :  { %1021 = vrot.lane.b32.xlu1 %v2441_v13, %s2189_s25 }
 0x7cf   :  { %v836_v15 = vpop.xlane.xlu0 %835 }
 0x7d0   :  { %v840_v16 = vsub.f32 %v779_v63, %v836_v15 }
 0x7d2   :  { %v842_v17 = vmul.f32 1.442695, %v840_v16 }
 0x7d3   :  { %v839_v18 = vpop.xlane.xlu1 %838 }
 0x7d4   :  { %1836 = vpow2.f32 %v842_v17  ;;  %v841_v20 = vsub.f32 %v829_v9, %v839_v18 }
 0x7d6   :  { %v844_v21 = vmul.f32 1.442695, %v841_v20 }
 0x7d7   :  { %v859_v22 = vpop.permute.xlu1 %858 }
 0x7d8   :  { %1838 = vpow2.f32 %v844_v21  ;;  %v864_v23 = vsel %vm400_vm3, %v859_v22, 0 }
 0x7d9   :  { %1712 = vmatpush3.bf16.msra.mxu1 %v864_v23 }
 0x7da   :  { %1723 = vmatprep.subr.bf16.mxu1 %v2178_v0 }
 0x7db   :  { %v974_v34 = vpop.permute.xlu1 %973 }
 0x7dc   :  { %v979_v38 = vsel %vm275_vm2, %v974_v34, 0  ;;  %v1811_v34 = vld [vmem:[#allocation9] sm:$0xff]  }
 0x7de   :  { %v1837_v24 = vpop.eup %1836 }
 0x7df   :  { %v846_v25 = vsel %vm275_vm2, %v1837_v24, 0.0  ;;  %v1024_v40 = vpop.permute.xlu1 %1023 }
 0x7e0   :  { %847 = vadd.xlane.f32.xlu0 %v846_v25  ;;  %v1029_v42 = vsel %vm275_vm2, %v1024_v40, 0 }
 0x7e2   :  { %v1839_v27 = vpop.eup %1838 }
 0x7e3   :  { %v849_v28 = vsel %vm275_vm2, %v1839_v27, 0.0  ;;  %v1022_v44 = vpop.permute.xlu1 %1021 }
 0x7e4   :  { %850 = vadd.xlane.f32.xlu0 %v849_v28 }
 0x7fa   :  { %906 = vrot.lane.b32.xlu0 %v2441_v13, %s2187_s26 }
 0x7fe   :  { %971 = vrot.lane.b32.xlu0 %v2438_v7, %s2189_s25 }
 0x86d   :  { %v848_v29 = vpop.xlane.xlu0 %847 }
 0x86e   :  { %1840 = vrcp.f32 %v848_v29 }
 0x871   :  { %v851_v30 = vpop.xlane.xlu0 %850 }
 0x872   :  { %1842 = vrcp.f32 %v851_v30 }
 0x875   :  { %v907_v31 = vpop.permute.xlu0 %906 }
 0x876   :  { %v912_v32 = vsel %vm400_vm3, %v907_v31, 0 }
 0x877   :  { %1718 = vmatpush3.bf16.msra.mxu0 %v912_v32 }
 0x878   :  { %v1841_v33 = vpop.eup %1840  ;;  %1729 = vmatprep.subr.bf16.mxu0 %v2178_v0 }
 0x879   :  { %v854_v35 = vmul.f32 %v1841_v33, %v1837_v24  ;;  %v972_v43 = vpop.permute.xlu0 %971 }
 0x87b   :  { %v856_v36 = vpack.c.bf16 %v854_v35, %v854_v35  ;;  %v1812_v35 = vld [vmem:[#allocation9 + $0x8] sm:$0xff]  }
 0x87c   :  { %v1843_v37 = vpop.eup %1842 }
 0x87d   :  { %v855_v39 = vmul.f32 %v1843_v37, %v1839_v27  ;;  %1714 = vmatmul.mubr.msk.bf16.vlgmr.msra.gmra.mrb[20].mxu1 %vm275_vm2, %v856_v36 }
 0x87e   :  { %1724 = vmatpush3.bf16.xpose.msra.mxu1 %v979_v38  ;;  %1725 = vmatprep.mubr.msk.bf16.mxu1 %vm2179_vm0, %v2178_v0 }
 0x87f   :  { %v857_v41 = vpack.c.bf16 %v855_v39, %v855_v39  ;;  %1735 = vmatprep.subr.bf16.mxu1 %v2178_v0 }
 0x881   :  { %1720 = vmatmul.mubr.msk.bf16.vlgmr.msra.gmra.mrb[24].mxu0 %vm275_vm2, %v857_v41 }
 0x882   :  { %1730 = vmatpush3.bf16.xpose.msra.mxu0 %v1029_v42  ;;  %1731 = vmatprep.mubr.msk.bf16.mxu0 %vm2179_vm0, %v2178_v0 }
 0x883   :  { %1741 = vmatprep.subr.bf16.mxu0 %v2178_v0 }
 0x885   :  { %1726 = vmatmul.mubr.msk.bf16.vlgmr.msra.gmra.mrb[24].mxu1 %vm275_vm2, %v972_v43 }
 0x886   :  { %1737 = vmatprep.mubr.msk.bf16.mxu1 %vm2179_vm0, %v2178_v0 }
 0x889   :  { %1732 = vmatmul.mubr.msk.bf16.vlgmr.msra.gmra.mrb[28].mxu0 %vm275_vm2, %v1022_v44 }
 0x88a   :  { %1743 = vmatprep.mubr.msk.bf16.mxu0 %vm2179_vm0, %v2178_v0 }
 0x950   :  { %v900_v45 = vpop.f32.mrb[20].mxu1 }
 0x951   :  { %v1715_v46 = vpop.f32.mrb[21].mxu1  ;;  %v1593_v22 = vpack.c.bf16 %v900_v45, %v900_v45 }
 0x952   :  { %v903_v47 = vpop.f32.mrb[22].mxu1 }
 0x953   :  { %v1716_v48 = vpop.f32.mrb[23].mxu1 }
 0x954   :  { %v948_v49 = vpop.f32.mrb[24].mxu0 }
 0x955   :  { %v1721_v50 = vpop.f32.mrb[25].mxu0 }
 0x956   :  { %v951_v51 = vpop.f32.mrb[26].mxu0 }
 0x957   :  { %v1722_v52 = vpop.f32.mrb[27].mxu0 }
 0x958   :  { %v1015_v53 = vpop.f32.mrb[24].mxu1 }
 0x959   :  { %v1016_v55 = vadd.f32 %v1015_v53, %v2456_v19  ;;  %v1727_v56 = vpop.f32.mrb[25].mxu1  ;;  %v1591_v19 = vpack.c.bf16 %v2526_v54, %v2526_v54 }
 0x95a   :  { %v1018_v57 = vpop.f32.mrb[26].mxu1 }
 0x95b   :  { %v1728_v59 = vpop.f32.mrb[27].mxu1  ;;  %v1071_v60 = vsel %vm275_vm2, %v1016_v55, -inf }
 0x95c   :  { %1072 = vmax.xlane.f32.xlu0 %v1071_v60  ;;  %v1065_v61 = vpop.f32.mrb[28].mxu0 }
 0x95d   :  { %v1066_v62 = vadd.f32 %v1065_v61, %v2460_v26  ;;  %v1733_v63 = vpop.f32.mrb[29].mxu0  ;;  %v1594_v26 = vpack.c.bf16 %v948_v49, %v948_v49 }
 0x95e   :  { %v1068_v1 = vpop.f32.mrb[30].mxu0 }
 0x95f   :  { %v1734_v2 = vpop.f32.mrb[31].mxu0  ;;  %v1074_v5 = vsel %vm275_vm2, %v1066_v62, -inf }
 0x960   :  { %1075 = vmax.xlane.f32.xlu1 %v1074_v5 }
 0x971   :  { %1095 = vrot.lane.b32.xlu1 %v2438_v7, %s2190_s27 }
 0x975   :  { %725 = vrot.lane.b32.xlu1 %v1591_v19, %s2164_s14  ;;  %v1814_v19 = vld [vmem:[#allocation14] sm:$0xff]  }
 0x979   :  { %727 = vrot.lane.b32.xlu1 %v1592_v6, %s2164_s14  ;;  %v1815_v6 = vld [vmem:[#allocation14 + $0x8] sm:$0xff]  }
 0x97d   :  { %964 = vrot.lane.b32.xlu1 %v1594_v26, %s2191_s18  ;;  %v1816_v26 = vld [vmem:[#allocation17] sm:$0xff]  }
 0x9e9   :  { %v1073_v8 = vpop.xlane.xlu0 %1072 }
 0x9ea   :  { %v1077_v9 = vsub.f32 %v1016_v55, %v1073_v8  ;;  %v1817_v8 = vld [vmem:[#allocation17 + $0x8] sm:$0xff]  }
 0x9ec   :  { %v1079_v10 = vmul.f32 1.442695, %v1077_v9 }
 0x9ed   :  { %v1076_v11 = vpop.xlane.xlu1 %1075 }
 0x9ee   :  { %1844 = vpow2.f32 %v1079_v10  ;;  %v1078_v12 = vsub.f32 %v1066_v62, %v1076_v11 }
 0x9f0   :  { %v1081_v7 = vmul.f32 1.442695, %v1078_v12 }
 0x9f1   :  { %v1096_v14 = vpop.permute.xlu1 %1095 }
 0x9f2   :  { %1846 = vpow2.f32 %v1081_v7  ;;  %v1101_v54 = vsel %vm400_vm3, %v1096_v14, 0 }
 0x9f3   :  { %1736 = vmatpush3.bf16.msra.mxu1 %v1101_v54 }
 0x9f4   :  { %1747 = vmatprep.subr.bf16.mxu1 %v2178_v0 }
 0x9f5   :  { %v726_v58 = vpop.permute.xlu1 %725 }
 0x9f6   :  { %732 = vst.msk [vmem:[#allocation2] sm:$0xf] %vm731_vm5, %v726_v58 }
 0x9f8   :  { %v1845_v15 = vpop.eup %1844 }
 0x9f9   :  { %v728_v16 = vpop.permute.xlu1 %727  ;;  %v1083_v17 = vsel %vm275_vm2, %v1845_v15, 0.0 }
 0x9fa   :  { %733 = vst.msk [vmem:[#allocation2 + $0x4] sm:$0xf] %vm731_vm5, %v728_v16  ;;  %1084 = vadd.xlane.f32.xlu0 %v1083_v17 }
 0x9fc   :  { %v1847_v18 = vpop.eup %1846 }
 0x9fd   :  { %v965_v20 = vpop.permute.xlu1 %964  ;;  %v1086_v21 = vsel %vm275_vm2, %v1847_v18, 0.0 }
 0x9fe   :  { %970 = vst.msk [vmem:[#allocation2 + $0x4] sm:$0xf] %vm968_vm6, %v965_v20  ;;  %1087 = vadd.xlane.f32.xlu0 %v1086_v21  ;;  %v1578_v20 = vld [vmem:[#allocation12] ss:$0 sm:$0xff] }
 0xa14   :  { %1143 = vrot.lane.b32.xlu0 %v2441_v13, %s2190_s27 }
 0xa18   :  { %962 = vrot.lane.b32.xlu0 %v1593_v22, %s2191_s18 }
 0xa87   :  { %v1085_v23 = vpop.xlane.xlu0 %1084 }
 0xa88   :  { %1848 = vrcp.f32 %v1085_v23 }
 0xa8b   :  { %v1088_v24 = vpop.xlane.xlu0 %1087 }
 0xa8c   :  { %1850 = vrcp.f32 %v1088_v24 }
 0xa8f   :  { %v1144_v25 = vpop.permute.xlu0 %1143 }
 0xa90   :  { %v1149_v27 = vsel %vm400_vm3, %v1144_v25, 0  ;;  %v1818_v25 = vld [vmem:[#allocation17 + $0x10] sm:$0xff]  }
 0xa91   :  { %1742 = vmatpush3.bf16.msra.mxu0 %v1149_v27  ;;  %v1819_v27 = vld [vmem:[#allocation17 + $0x18] sm:$0xff]  }
 0xa92   :  { %v1849_v28 = vpop.eup %1848  ;;  %1755 = vmatprep.subr.bf16.mxu0 %v2178_v0 }
 0xa93   :  { %v1091_v29 = vmul.f32 %v1849_v28, %v1845_v15  ;;  %v963_v30 = vpop.permute.xlu0 %962  ;;  %v1577_v15 = vld [vmem:[#allocation11] ss:$0 sm:$0xff]  ;;  %v1579_v28 = vld [vmem:[#allocation15] ss:$0 sm:$0xff] }
 0xa94   :  { %969 = vst.msk [vmem:[#allocation2] sm:$0xf] %vm968_vm6, %v963_v30 }
 0xa95   :  { %v1093_v31 = vpack.c.bf16 %v1091_v29, %v1091_v29 }
 0xa96   :  { %v1851_v32 = vpop.eup %1850 }
 0xa97   :  { %v1092_v13 = vmul.f32 %v1851_v32, %v1847_v18  ;;  %1738 = vmatmul.mubr.msk.bf16.vlgmr.msra.gmra.mrb[28].mxu1 %vm275_vm2, %v1093_v31 }
 0xa98   :  { %1751 = vmatprep.mubr.msk.bf16.mxu1 %vm2179_vm0, %v2178_v0  ;;  %1748 = vmatpush3.bf16.msra.mxu1 %v1811_v34 }
 0xa99   :  { %v1094_v33 = vpack.c.bf16 %v1092_v13, %v1092_v13  ;;  %1749 = vmatprep.subr.bf16.mxu1 %v2178_v0 }
 0xa9b   :  { %1744 = vmatmul.mubr.msk.bf16.vlgmr.msra.gmra.mrb[32].mxu0 %vm275_vm2, %v1094_v33 }
 0xa9c   :  { %1759 = vmatprep.mubr.msk.bf16.mxu0 %vm2179_vm0, %v2178_v0  ;;  %1750 = vmatpush3.bf16.msra.mxu1 %v1812_v35 }
 0xa9d   :  { %1763 = vmatprep.subr.bf16.mxu1 %v2178_v0  ;;  %1756 = vmatpush3.bf16.msra.mxu0 %v1814_v19  ;;  %v1590_v19 = vld [vmem:[#allocation21] ss:$0 sm:$0xff] }
 0xa9e   :  { %1757 = vmatprep.subr.bf16.mxu0 %v2178_v0 }
 0xaa1   :  { %1758 = vmatpush3.bf16.msra.mxu0 %v1815_v6 }
 0xb6a   :  { %v1137_v36 = vpop.f32.mrb[28].mxu1 }
 0xb6b   :  { %v1595_v37 = vpack.c.bf16 %v1137_v36, %v1137_v36  ;;  %v1739_v38 = vpop.f32.mrb[29].mxu1 }
 0xb6c   :  { %v1140_v39 = vpop.f32.mrb[30].mxu1 }
 0xb6d   :  { %1199 = vrot.lane.b32.xlu0 %v1595_v37, %s2192_s4  ;;  %v1740_v40 = vpop.f32.mrb[31].mxu1  ;;  %v1583_v37 = vld [vmem:[#allocation18] ss:$0 sm:$0xff] }
 0xb6e   :  { %v1185_v41 = vpop.f32.mrb[32].mxu0 }
 0xb6f   :  { %v1596_v42 = vpack.c.bf16 %v1185_v41, %v1185_v41  ;;  %v1745_v43 = vpop.f32.mrb[33].mxu0 }
 0xb70   :  { %v1188_v44 = vpop.f32.mrb[34].mxu0 }
 0xb71   :  { %1201 = vrot.lane.b32.xlu1 %v1596_v42, %s2192_s4  ;;  %v1746_v45 = vpop.f32.mrb[35].mxu0 }
 0xbdf   :  { %v1200_v46 = vpop.permute.xlu0 %1199 }
 0xbe0   :  { %1206 = vst.msk [vmem:[#allocation2] sm:$0xf] %vm1205_vm7, %v1200_v46 }
 0xbe3   :  { %v1202_v47 = vpop.permute.xlu1 %1201 }
 0xbe4   :  { %1207 = vst.msk [vmem:[#allocation2 + $0x4] sm:$0xf] %vm1205_vm7, %v1202_v47 }
 0xbeb   :  { %v1813_v48 = vld [vmem:[#allocation2] sm:$0xff]  }
 0xbec   :  { %1752 = vmatmul.mubr.msk.bf16.vlgmr.msra.gmra.mrb[32].mxu1 %vm213_vm1, %v1813_v48 }
 0xbed   :  { %1771 = vmatprep.mubr.msk.bf16.mxu1 %vm2179_vm0, %v2178_v0  ;;  %1764 = vmatpush3.bf16.msra.mxu1 %v1816_v26 }
 0xbee   :  { %1765 = vmatprep.subr.bf16.mxu1 %v2178_v0 }
 0xbf1   :  { %1766 = vmatpush3.bf16.msra.mxu1 %v1817_v8 }
 0xbf2   :  { %1767 = vmatprep.subr.bf16.mxu1 %v2178_v0 }
 0xbf5   :  { %1768 = vmatpush3.bf16.msra.mxu1 %v1818_v25 }
 0xbf6   :  { %1769 = vmatprep.subr.bf16.mxu1 %v2178_v0 }
 0xbf9   :  { %1770 = vmatpush3.bf16.msra.mxu1 %v1819_v27 }
 0xcbf   :  { %v1268_v49 = vpop.f32.mrb[32].mxu1 }
 0xcc0   :  { %v1275_v50 = vadd.f32 %v1268_v49, %v2427_v3  ;;  %v1753_v51 = vpop.f32.mrb[33].mxu1 }
 0xcc1   :  { %v1271_v52 = vpop.f32.mrb[34].mxu1 }
 0xcc2   :  { %v1276_v53 = vadd.f32 %v1271_v52, %v2429_v4  ;;  %v1754_v55 = vpop.f32.mrb[35].mxu1  ;;  %v1277_v56 = vsel %vm213_vm1, %v1275_v50, 0.0 }
 0xcc3   :  { %1278 = vadd.xlane.f32.xlu0 %v1277_v56 }
 0xcc4   :  { %v1280_v57 = vsel %vm213_vm1, %v1276_v53, 0.0 }
 0xcc5   :  { %1281 = vadd.xlane.f32.xlu1 %v1280_v57 }
 0xd50   :  { %v1279_v59 = vpop.xlane.xlu0 %1278 }
 0xd51   :  { %v1284_v60 = vmul.f32 0.03125, %v1279_v59 }
 0xd52   :  { %v1282_v61 = vpop.xlane.xlu1 %1281 }
 0xd53   :  { %v1286_v62 = vsub.f32 %v1275_v50, %v1284_v60  ;;  %v1285_v63 = vmul.f32 0.03125, %v1282_v61 }
 0xd55   :  { %v1287_v1 = vsub.f32 %v1276_v53, %v1285_v63  ;;  %v1288_v2 = vmul.f32 %v1286_v62, %v1286_v62 }
 0xd57   :  { %v1290_v3 = vsel %vm213_vm1, %v1288_v2, 0.0  ;;  %v1289_v5 = vmul.f32 %v1287_v1, %v1287_v1 }
 0xd58   :  { %1291 = vadd.xlane.f32.xlu0 %v1290_v3  ;;  %v1589_v3 = vld [vmem:[#allocation20] ss:$0 sm:$0xff] }
 0xd59   :  { %v1293_v4 = vsel %vm213_vm1, %v1289_v5, 0.0 }
 0xd5c   :  { %1294 = vadd.xlane.f32.xlu0 %v1293_v4 }
 0xde5   :  { %v1292_v9 = vpop.xlane.xlu0 %1291 }
 0xde6   :  { %v1296_v10 = vmul.f32 0.03125, %v1292_v9 }
 0xde8   :  { %v1298_v11 = vadd.f32 1e-05, %v1296_v10 }
 0xde9   :  { %v1295_v12 = vpop.xlane.xlu0 %1294 }
 0xdea   :  { %1852 = vrsqrt.f32 %v1298_v11  ;;  %v1297_v7 = vmul.f32 0.03125, %v1295_v12 }
 0xdec   :  { %v1299_v14 = vadd.f32 1e-05, %v1297_v7 }
 0xdee   :  { %1854 = vrsqrt.f32 %v1299_v14 }
 0xdf4   :  { %v1853_v54 = vpop.eup %1852 }
 0xdf5   :  { %v1302_v58 = vmul.f32 %v1853_v54, %v1286_v62 }
 0xdf7   :  { %v1311_v17 = vmul.f32 %v1577_v15, %v1302_v58 }
 0xdf8   :  { %v1855_v16 = vpop.eup %1854 }
 0xdf9   :  { %v1303_v18 = vmul.f32 %v1855_v16, %v1287_v1  ;;  %v1320_v22 = vadd.f32 %v1578_v20, %v1311_v17 }
 0xdfb   :  { %v1312_v21 = vmul.f32 %v1577_v15, %v1303_v18 }
 0xdfd   :  { %v1321_v23 = vadd.f32 %v1578_v20, %v1312_v21 }
 0xdff   :  { %v1322_v24 = vpack.c.bf16 %v1321_v23, %v1320_v22 }
 0xe01   :  { %1760 = vmatmul.mubr.msk.bf16.vlgmr.msra.gmra.mrb[36].mxu0 %vm213_vm1, %v1322_v24 }
 0xed4   :  { %v1383_v29 = vpop.f32.mrb[36].mxu0 }
 0xed5   :  { %v1384_v30 = vadd.f32 %v1579_v28, %v1383_v29  ;;  %v1761_v31 = vpop.f32.mrb[37].mxu0 }
 0xed6   :  { %v1386_v32 = vpop.f32.mrb[38].mxu0 }
 0xed7   :  { %v1387_v13 = vadd.f32 %v1579_v28, %v1386_v32  ;;  %v1762_v33 = vpop.f32.mrb[39].mxu0  ;;  %v1390_v34 = vmax.f32 %v1384_v30, 0.0 }
 0xed9   :  { %v1391_v35 = vmax.f32 %v1387_v13, 0.0 }
 0xedb   :  { %v1392_v36 = vpack.c.bf16 %v1391_v35, %v1390_v34 }
 0xedd   :  { %1772 = vmatmul.mubr.msk.bf16.vlgmr.msra.gmra.mrb[36].mxu1 %vm1432_vm8, %v1392_v36 }
 0xfb0   :  { %v1470_v38 = vpop.f32.mrb[36].mxu1 }
 0xfb1   :  { %v1471_v39 = vadd.f32 %v1583_v37, %v1470_v38  ;;  %v1773_v40 = vpop.f32.mrb[37].mxu1 }
 0xfb2   :  { %v1473_v41 = vpop.f32.mrb[38].mxu1 }
 0xfb3   :  { %v1474_v0 = vadd.f32 %v1583_v37, %v1473_v41  ;;  %v1774_v42 = vpop.f32.mrb[39].mxu1  ;;  %v1477_v43 = vadd.f32 %v1471_v39, %v1320_v22 }
 0xfb5   :  { %v1479_v44 = vsel %vm213_vm1, %v1477_v43, 0.0  ;;  %v1478_v45 = vadd.f32 %v1474_v0, %v1321_v23 }
 0xfb6   :  { %1480 = vadd.xlane.f32.xlu1 %v1479_v44 }
 0xfb7   :  { %v1482_v46 = vsel %vm213_vm1, %v1478_v45, 0.0 }
 0xfb8   :  { %1483 = vadd.xlane.f32.xlu0 %v1482_v46 }
0x1043   :  { %v1481_v47 = vpop.xlane.xlu1 %1480 }
0x1044   :  { %v1485_v48 = vmul.f32 0.03125, %v1481_v47 }
0x1045   :  { %v1484_v49 = vpop.xlane.xlu0 %1483 }
0x1046   :  { %v1487_v50 = vsub.f32 %v1477_v43, %v1485_v48  ;;  %v1486_v51 = vmul.f32 0.03125, %v1484_v49 }
0x1048   :  { %v1488_v52 = vsub.f32 %v1478_v45, %v1486_v51  ;;  %v1489_v53 = vmul.f32 %v1487_v50, %v1487_v50 }
0x104a   :  { %v1491_v55 = vsel %vm213_vm1, %v1489_v53, 0.0  ;;  %v1490_v56 = vmul.f32 %v1488_v52, %v1488_v52 }
0x104b   :  { %1492 = vadd.xlane.f32.xlu1 %v1491_v55 }
0x104c   :  { %v1494_v57 = vsel %vm213_vm1, %v1490_v56, 0.0 }
0x104d   :  { %1495 = vadd.xlane.f32.xlu0 %v1494_v57 }
0x10d8   :  { %v1493_v59 = vpop.xlane.xlu1 %1492 }
0x10d9   :  { %v1497_v60 = vmul.f32 0.03125, %v1493_v59 }
0x10da   :  { %v1496_v61 = vpop.xlane.xlu0 %1495 }
0x10db   :  { %v1499_v62 = vadd.f32 1e-05, %v1497_v60  ;;  %v1498_v63 = vmul.f32 0.03125, %v1496_v61 }
0x10dd   :  { %1856 = vrsqrt.f32 %v1499_v62  ;;  %v1500_v1 = vadd.f32 1e-05, %v1498_v63 }
0x10df   :  { %1858 = vrsqrt.f32 %v1500_v1 }
0x10e7   :  { %v1857_v2 = vpop.eup %1856 }
0x10e8   :  { %v1503_v5 = vmul.f32 %v1857_v2, %v1487_v50 }
0x10e9   :  { %v1859_v4 = vpop.eup %1858 }
0x10ea   :  { %v1504_v6 = vmul.f32 %v1859_v4, %v1488_v52  ;;  %v1512_v26 = vmul.f32 %v1589_v3, %v1503_v5 }
0x10ec   :  { %v1513_v8 = vmul.f32 %v1589_v3, %v1504_v6  ;;  %v1521_v9 = vadd.f32 %v1590_v19, %v1512_v26 }
0x10ee   :  { %v1522_v10 = vadd.f32 %v1590_v19, %v1513_v8  ;;  %1523 = vst.msk [vmem:[#allocation23] sm:$0xff] %vm213_vm1, %v1521_v9 }
0x10f0   :  { %1524 = vst.msk [vmem:[#allocation23 + $0x8] sm:$0xff] %vm213_vm1, %v1522_v10 }
0x10f1   :  { %2135 = shalt.err (!%p2132_p2)
}
0x10f2   :  { %s2136_s9 = scalar_lea.hbm %s2639_s12, 256 }
0x10f3   :  { %p2137_p3 = scmp.ne.s32.totalorder %s2639_s12, %s2136_s9  ;;  %p2140_p4 = scmp.lt.u32.totalorder %s2136_s9, %s2639_s12 }
0x10f5   :  { %p2142_p5 = pnand %p2140_p4, %p2137_p3 }
0x10f7   :  { %2145 = shalt.err (!%p2142_p5)
}
0x10f8   :  { %1536 = dma.vmem_to_hbm [thread:$0]  %s1531_s8, 256, %s2639_s12, [#allocation5], %s2163_s13, %s2163_s13, %s2164_s14  }
0x10f9   :  { %2160 = dma.done.wait [#allocation5], 256  }
0x10fa   :  { %2161 = vsyncadd [#allocation5], 4294967040 }
0x10fb   :  { %1540 = vsyncpa [#allocation4], 1 }
0x10fc   :  { %1541 = vsyncpa [#allocation7], 1 }
0x10fd   :  { %1542 = vsyncpa [#allocation10], 1 }
0x10fe   :  { %1543 = vsyncpa [#allocation13], 1 }
0x10ff   :  { %1544 = vsyncpa [#allocation16], 1 }
0x1100   :  { %1545 = vsyncpa [#allocation19], 1 }
0x1101   :  { %1546 = vsyncpa [#allocation22], 1 }
0x1102   :  { %1547 = vsyncpa [#allocation5], 1 }

</bundles_post_ra>
